<compile_context>
chip_gen: v5e
topology: v5e:2x2
jax: 0.10.0
libtpu: 0.0.40
codegen_flags: <defaults>
</compile_context>

<pallas_src>
import functools

import jax
import jax.numpy as jnp
import numpy as np
from jax.experimental import pallas as pl
from jax.experimental.pallas import tpu as pltpu


def lstm_kernel(x_ref, h0_ref, c0_ref, w_ih_ref, w_hh_ref, b_ref,
                w_fc_ref, b_fc_ref, out_ref, h_sc, c_sc,
                *, t_blk, seq_len, hidden):
    """One grid step == one block of T_BLK LSTM time steps.

    h/c are carried across grid steps in VMEM scratch; within a block they are
    carried as values in a statically-unrolled Python loop (no per-step grid
    overhead, no per-step scratch round-trips).
    """
    tb = pl.program_id(0)
    nb = pl.num_programs(0)
    H = hidden

    @pl.when(tb == 0)
    def _():
        h_sc[...] = h0_ref[...]
        c_sc[...] = c0_ref[...]

    # ---- hoisted input projection for this time block (single MXU matmul) ----
    x_blk = x_ref[...]                                    # (B, T_BLK, D_in), matmul dtype
    B = x_blk.shape[0]
    d_in = x_blk.shape[2]
    w_ih = w_ih_ref[...]                                  # (D_in, 4H)
    xg = jnp.dot(x_blk.reshape(B * t_blk, d_in), w_ih,
                 preferred_element_type=jnp.float32)      # (B*T_BLK, 4H) f32
    # bias (b_ih + b_hh) broadcast once per block, hoisted out of the step loop
    xg = xg.reshape(B, t_blk, 4 * H) + b_ref[...]         # (B, T_BLK, 4H) f32

    # hoist loop-invariant loads out of the unrolled recurrence
    w_hh = w_hh_ref[...]                                  # (H, 4H), matmul dtype
    mxu_dtype = w_hh.dtype
    h = h_sc[...]                                         # (B, H) f32
    c = c_sc[...]                                         # (B, H) f32

    tail = (seq_len % t_blk) != 0                         # static Python bool

    for tt in range(t_blk):                               # static unroll
        # single per-step matmul on the serial critical path
        gates = xg[:, tt, :] + jnp.dot(h.astype(mxu_dtype), w_hh,
                                       preferred_element_type=jnp.float32)
        # gate math kept in f32 (v5e VPU/EUP have no bf16; preserves numerics)
        i_g = jax.nn.sigmoid(gates[:, 0 * H:1 * H])
        f_g = jax.nn.sigmoid(gates[:, 1 * H:2 * H])
        g_g = jnp.tanh(gates[:, 2 * H:3 * H])
        o_g = jax.nn.sigmoid(gates[:, 3 * H:4 * H])
        c_new = f_g * c + i_g * g_g
        h_new = o_g * jnp.tanh(c_new)
        if tail:
            # mask steps past the true sequence length (ragged last block)
            valid = (tb * t_blk + tt) < seq_len
            h = jnp.where(valid, h_new, h)
            c = jnp.where(valid, c_new, c)
        else:
            h, c = h_new, c_new

    h_sc[...] = h
    c_sc[...] = c

    @pl.when(tb == nb - 1)
    def _():
        # fc (H -> 1) + tanh as VPU multiply + lane reduction (keeps MXU clean;
        # avoids a 1-lane-wide matmul result).
        y = jnp.sum(h * w_fc_ref[...], axis=-1, keepdims=True) + b_fc_ref[...]
        out_ref[...] = jnp.tanh(y).astype(out_ref.dtype)


def lstm_model_forward(x, hidden, params, *, matmul_dtype=jnp.float32,
                       t_blk=None):
    """x: (B, T, D_in) float32; hidden: (h0, c0) each (1, B, H).

    matmul_dtype: operand dtype for the MXU matmuls (use jnp.bfloat16 on
    v6e/v7x for ~2x MXU throughput and half the weight VMEM footprint; f32
    accumulation and f32 cell state are kept either way).
    """
    h0, c0 = hidden
    B, T, D_in = x.shape
    H = params["w_hh"].shape[0]
    G = 4 * H

    if t_blk is None:
        # full sequence in one block when small; otherwise a multiple of 8
        # (second-minor BlockSpec dim must be 8-divisible or the full extent).
        t_blk = T if T <= 32 else 32
    num_blocks = pl.cdiv(T, t_blk)

    # matmul operands in matmul_dtype; everything elementwise stays f32
    x_in = x.astype(matmul_dtype)
    w_ih = params["w_ih"].astype(matmul_dtype)             # (D_in, 4H)
    w_hh = params["w_hh"].astype(matmul_dtype)             # (H, 4H)
    b = (params["b_ih"] + params["b_hh"]).reshape(1, G).astype(jnp.float32)
    w_fc = params["w_fc"].reshape(1, H).astype(jnp.float32)   # row layout for VPU reduce
    b_fc = params["b_fc"].reshape(1, 1).astype(jnp.float32)
    h0_2d = h0[0].astype(jnp.float32)
    c0_2d = c0[0].astype(jnp.float32)

    kernel = functools.partial(lstm_kernel, t_blk=t_blk, seq_len=T, hidden=H)

    # NOTE (v7x): w_ih/w_hh blocks are double-buffered by the pipeliner even
    # with constant index maps; at large H/D_in use bf16 operands (above) or
    # tile the 4H axis and set vmem_limit_bytes to keep headroom in 64 MiB VMEM.
    grid_spec = pltpu.PrefetchScalarGridSpec(
        num_scalar_prefetch=0,
        grid=(num_blocks,),
        in_specs=[
            pl.BlockSpec((B, t_blk, D_in), lambda tb: (0, tb, 0)),  # x (no host transpose)
            pl.BlockSpec((B, H), lambda tb: (0, 0)),                # h0
            pl.BlockSpec((B, H), lambda tb: (0, 0)),                # c0
            pl.BlockSpec((D_in, G), lambda tb: (0, 0)),             # w_ih
            pl.BlockSpec((H, G), lambda tb: (0, 0)),                # w_hh
            pl.BlockSpec((1, G), lambda tb: (0, 0)),                # bias (b_ih + b_hh)
            pl.BlockSpec((1, H), lambda tb: (0, 0)),                # w_fc row
            pl.BlockSpec((1, 1), lambda tb: (0, 0)),                # b_fc
        ],
        out_specs=pl.BlockSpec((B, 1), lambda tb: (0, 0)),
        scratch_shapes=[
            pltpu.VMEM((B, H), jnp.float32),   # h state (carried across blocks)
            pltpu.VMEM((B, H), jnp.float32),   # c state
        ],
    )

    return pl.pallas_call(
        kernel,
        out_shape=jax.ShapeDtypeStruct((B, 1), jnp.float32),
        grid_spec=grid_spec,
        compiler_params=pltpu.CompilerParams(
            dimension_semantics=("arbitrary",)),   # time axis is a recurrence
    )(x_in, h0_2d, c0_2d, w_ih, w_hh, b, w_fc, b_fc)


def lstm_model_reference(x, hidden, params):
    """Pure-JAX reference of the same forward pass (for correctness check)."""
    h = hidden[0][0]
    c = hidden[1][0]
    H = h.shape[1]
    b = params["b_ih"] + params["b_hh"]
    T = x.shape[1]
    for t in range(T):
        gates = x[:, t, :] @ params["w_ih"] + h @ params["w_hh"] + b
        i_g = jax.nn.sigmoid(gates[:, 0 * H:1 * H])
        f_g = jax.nn.sigmoid(gates[:, 1 * H:2 * H])
        g_g = jnp.tanh(gates[:, 2 * H:3 * H])
        o_g = jax.nn.sigmoid(gates[:, 3 * H:4 * H])
        c = f_g * c + i_g * g_g
        h = o_g * jnp.tanh(c)
    return jnp.tanh(h @ params["w_fc"] + params["b_fc"])


def init_params(key, input_size, hidden_size):
    """Deterministic synthetic parameters (PyTorch-style uniform init bound)."""
    ks = jax.random.split(key, 6)
    bound = 1.0 / np.sqrt(hidden_size)
    u = lambda k, shape: jax.random.uniform(k, shape, jnp.float32, -bound, bound)
    return {
        "w_ih": u(ks[0], (input_size, 4 * hidden_size)),
        "w_hh": u(ks[1], (hidden_size, 4 * hidden_size)),
        "b_ih": u(ks[2], (4 * hidden_size,)),
        "b_hh": u(ks[3], (4 * hidden_size,)),
        "w_fc": u(ks[4], (hidden_size, 1)),
        "b_fc": u(ks[5], (1,)),
    }


if __name__ == "__main__":
    B, T, D_IN, H = 2, 8, 16, 32

    key = jax.random.PRNGKey(0)
    k_x, k_p = jax.random.split(key)
    x = jax.random.normal(k_x, (B, T, D_IN), dtype=jnp.float32)
    params = init_params(k_p, D_IN, H)

    # init_hidden(batch_size): zeros, shape (num_layers=1, B, H)
    h0 = jnp.zeros((1, B, H), jnp.float32)
    c0 = jnp.zeros((1, B, H), jnp.float32)

    ref = lstm_model_reference(x, (h0, c0), params)

    # f32 matmul operands: tight parity with the pure-JAX reference.
    out_f32 = jax.block_until_ready(lstm_model_forward(x, (h0, c0), params))
    assert out_f32.shape == (B, 1)
    np.testing.assert_allclose(np.asarray(out_f32), np.asarray(ref),
                               rtol=1e-5, atol=1e-5)

    # bf16 matmul operands (v6e/v7x fast path); f32 accumulation + f32 cell
    # state keep the LSTM numerics, so only a loose tolerance is needed.
    out_bf16 = jax.block_until_ready(
        lstm_model_forward(x, (h0, c0), params, matmul_dtype=jnp.bfloat16))
    np.testing.assert_allclose(np.asarray(out_bf16), np.asarray(ref),
                               rtol=5e-2, atol=5e-2)

    print("KERNEL_OK")
</pallas_src>

<mosaic_0001>
module attributes {stable_mosaic.version = 11 : i64} {
  func.func @lstm_kernel(%arg0: i32, %arg1: memref<2x8x16xf32, #tpu.memory_space<vmem>>, %arg2: memref<2x32xf32, #tpu.memory_space<vmem>>, %arg3: memref<2x32xf32, #tpu.memory_space<vmem>>, %arg4: memref<16x128xf32, #tpu.memory_space<vmem>>, %arg5: memref<32x128xf32, #tpu.memory_space<vmem>>, %arg6: memref<1x128xf32, #tpu.memory_space<vmem>>, %arg7: memref<1x32xf32, #tpu.memory_space<vmem>>, %arg8: memref<1x1xf32, #tpu.memory_space<vmem>>, %arg9: memref<2x1xf32, #tpu.memory_space<vmem>>, %arg10: memref<2x32xf32, #tpu.memory_space<vmem>>, %arg11: memref<2x32xf32, #tpu.memory_space<vmem>>) attributes {dimension_semantics = [#tpu.dimension_semantics<arbitrary>], iteration_bounds = array<i64: 1>, scalar_prefetch = 0 : i64, scratch_operands = 2 : i64, tpu.core_type = #tpu.core_type<tc>, window_params = [{transform_indices = @transform_0, window_bounds = array<i64: 2, 8, 16>}, {pipeline_mode = #tpu.pipeline_mode<synchronous>, transform_indices = @transform_1, window_bounds = array<i64: 2, 32>}, {pipeline_mode = #tpu.pipeline_mode<synchronous>, transform_indices = @transform_2, window_bounds = array<i64: 2, 32>}, {pipeline_mode = #tpu.pipeline_mode<synchronous>, transform_indices = @transform_3, window_bounds = array<i64: 16, 128>}, {pipeline_mode = #tpu.pipeline_mode<synchronous>, transform_indices = @transform_4, window_bounds = array<i64: 32, 128>}, {pipeline_mode = #tpu.pipeline_mode<synchronous>, transform_indices = @transform_5, window_bounds = array<i64: 1, 128>}, {pipeline_mode = #tpu.pipeline_mode<synchronous>, transform_indices = @transform_6, window_bounds = array<i64: 1, 32>}, {pipeline_mode = #tpu.pipeline_mode<synchronous>, transform_indices = @transform_7, window_bounds = array<i64: 1, 1>}, {pipeline_mode = #tpu.pipeline_mode<synchronous>, transform_indices = @transform_8, window_bounds = array<i64: 2, 1>}]} {
    %c0_i32 = arith.constant 0 : i32
    %0 = arith.cmpi eq, %arg0, %c0_i32 : i32
    %1 = arith.extui %0 : i1 to i32
    %c0_i32_0 = arith.constant 0 : i32
    %2 = arith.cmpi ne, %1, %c0_i32_0 : i32
    scf.if %2 {
      %c0_51 = arith.constant 0 : index
      %c0_52 = arith.constant 0 : index
      %252 = vector.load %arg2[%c0_51, %c0_52] : memref<2x32xf32, #tpu.memory_space<vmem>>, vector<2x32xf32>
      %c0_53 = arith.constant 0 : index
      %c0_54 = arith.constant 0 : index
      %253 = vector.load %arg10[%c0_53, %c0_54] : memref<2x32xf32, #tpu.memory_space<vmem>>, vector<2x32xf32>
      tpu.vector_store %arg10[%c0_53, %c0_54], %252 {strides = array<i32>} : memref<2x32xf32, #tpu.memory_space<vmem>>, vector<2x32xf32>,
      %c0_55 = arith.constant 0 : index
      %c0_56 = arith.constant 0 : index
      %254 = vector.load %arg3[%c0_55, %c0_56] : memref<2x32xf32, #tpu.memory_space<vmem>>, vector<2x32xf32>
      %c0_57 = arith.constant 0 : index
      %c0_58 = arith.constant 0 : index
      %255 = vector.load %arg11[%c0_57, %c0_58] : memref<2x32xf32, #tpu.memory_space<vmem>>, vector<2x32xf32>
      tpu.vector_store %arg11[%c0_57, %c0_58], %254 {strides = array<i32>} : memref<2x32xf32, #tpu.memory_space<vmem>>, vector<2x32xf32>,
    } else {
    }
    %c0 = arith.constant 0 : index
    %c0_1 = arith.constant 0 : index
    %c0_2 = arith.constant 0 : index
    %3 = vector.load %arg1[%c0, %c0_1, %c0_2] : memref<2x8x16xf32, #tpu.memory_space<vmem>>, vector<2x8x16xf32>
    %c0_3 = arith.constant 0 : index
    %c0_4 = arith.constant 0 : index
    %4 = vector.load %arg4[%c0_3, %c0_4] : memref<16x128xf32, #tpu.memory_space<vmem>>, vector<16x128xf32>
    %5 = vector.shape_cast %3 : vector<2x8x16xf32> to vector<16x16xf32>
    %cst = arith.constant dense<0.000000e+00> : vector<16x128xf32>
    %6 = tpu.matmul %5, %4, %cst {dimension_numbers = #tpu.dot_dimension_numbers<[1], [0], [0], [1], [0, 0, 1, 1], [], []>} : vector<16x16xf32>, vector<16x128xf32>, vector<16x128xf32> -> vector<16x128xf32>
    %7 = vector.shape_cast %6 : vector<16x128xf32> to vector<2x8x128xf32>
    %c0_5 = arith.constant 0 : index
    %c0_6 = arith.constant 0 : index
    %8 = vector.load %arg6[%c0_5, %c0_6] : memref<1x128xf32, #tpu.memory_space<vmem>>, vector<1x128xf32>
    %9 = vector.shape_cast %8 : vector<1x128xf32> to vector<1x1x128xf32>
    %10 = vector.broadcast %9 : vector<1x1x128xf32> to vector<2x8x128xf32>
    %11 = arith.addf %7, %10 : vector<2x8x128xf32>
    %c0_7 = arith.constant 0 : index
    %c0_8 = arith.constant 0 : index
    %12 = vector.load %arg5[%c0_7, %c0_8] : memref<32x128xf32, #tpu.memory_space<vmem>>, vector<32x128xf32>
    %c0_9 = arith.constant 0 : index
    %c0_10 = arith.constant 0 : index
    %13 = vector.load %arg10[%c0_9, %c0_10] : memref<2x32xf32, #tpu.memory_space<vmem>>, vector<2x32xf32>
    %c0_11 = arith.constant 0 : index
    %c0_12 = arith.constant 0 : index
    %14 = vector.load %arg11[%c0_11, %c0_12] : memref<2x32xf32, #tpu.memory_space<vmem>>, vector<2x32xf32>
    %15 = vector.extract_strided_slice %11 {offsets = [0, 0, 0], sizes = [2, 1, 128], strides = [1, 1, 1]} : vector<2x8x128xf32> to vector<2x1x128xf32>
    %16 = vector.shape_cast %15 : vector<2x1x128xf32> to vector<2x128xf32>
    %cst_13 = arith.constant dense<0.000000e+00> : vector<2x128xf32>
    %17 = tpu.matmul %13, %12, %cst_13 {dimension_numbers = #tpu.dot_dimension_numbers<[1], [0], [0], [1], [0, 0, 1, 1], [], []>} : vector<2x32xf32>, vector<32x128xf32>, vector<2x128xf32> -> vector<2x128xf32>
    %18 = arith.addf %16, %17 : vector<2x128xf32>
    %19 = vector.extract_strided_slice %18 {offsets = [0, 0], sizes = [2, 32], strides = [1, 1]} : vector<2x128xf32> to vector<2x32xf32>
    %20 = arith.negf %19 : vector<2x32xf32>
    %21 = math.exp %20 : vector<2x32xf32>
    %cst_14 = arith.constant 1.000000e+00 : f32
    %22 = vector.broadcast %cst_14 : f32 to vector<2x32xf32>
    %23 = arith.addf %22, %21 : vector<2x32xf32>
    %24 = arith.divf %22, %23 : vector<2x32xf32>
    %25 = vector.extract_strided_slice %18 {offsets = [0, 32], sizes = [2, 32], strides = [1, 1]} : vector<2x128xf32> to vector<2x32xf32>
    %26 = arith.negf %25 : vector<2x32xf32>
    %27 = math.exp %26 : vector<2x32xf32>
    %cst_15 = arith.constant 1.000000e+00 : f32
    %28 = vector.broadcast %cst_15 : f32 to vector<2x32xf32>
    %29 = arith.addf %28, %27 : vector<2x32xf32>
    %30 = arith.divf %28, %29 : vector<2x32xf32>
    %31 = vector.extract_strided_slice %18 {offsets = [0, 64], sizes = [2, 32], strides = [1, 1]} : vector<2x128xf32> to vector<2x32xf32>
    %32 = math.tanh %31 : vector<2x32xf32>
    %33 = vector.extract_strided_slice %18 {offsets = [0, 96], sizes = [2, 32], strides = [1, 1]} : vector<2x128xf32> to vector<2x32xf32>
    %34 = arith.negf %33 : vector<2x32xf32>
    %35 = math.exp %34 : vector<2x32xf32>
    %cst_16 = arith.constant 1.000000e+00 : f32
    %36 = vector.broadcast %cst_16 : f32 to vector<2x32xf32>
    %37 = arith.addf %36, %35 : vector<2x32xf32>
    %38 = arith.divf %36, %37 : vector<2x32xf32>
    %39 = arith.mulf %30, %14 : vector<2x32xf32>
    %40 = arith.mulf %24, %32 : vector<2x32xf32>
    %41 = arith.addf %39, %40 : vector<2x32xf32>
    %42 = math.tanh %41 : vector<2x32xf32>
    %43 = arith.mulf %38, %42 : vector<2x32xf32>
    %44 = vector.extract_strided_slice %11 {offsets = [0, 1, 0], sizes = [2, 1, 128], strides = [1, 1, 1]} : vector<2x8x128xf32> to vector<2x1x128xf32>
    %45 = vector.shape_cast %44 : vector<2x1x128xf32> to vector<2x128xf32>
    %cst_17 = arith.constant dense<0.000000e+00> : vector<2x128xf32>
    %46 = tpu.matmul %43, %12, %cst_17 {dimension_numbers = #tpu.dot_dimension_numbers<[1], [0], [0], [1], [0, 0, 1, 1], [], []>} : vector<2x32xf32>, vector<32x128xf32>, vector<2x128xf32> -> vector<2x128xf32>
    %47 = arith.addf %45, %46 : vector<2x128xf32>
    %48 = vector.extract_strided_slice %47 {offsets = [0, 0], sizes = [2, 32], strides = [1, 1]} : vector<2x128xf32> to vector<2x32xf32>
    %49 = arith.negf %48 : vector<2x32xf32>
    %50 = math.exp %49 : vector<2x32xf32>
    %cst_18 = arith.constant 1.000000e+00 : f32
    %51 = vector.broadcast %cst_18 : f32 to vector<2x32xf32>
    %52 = arith.addf %51, %50 : vector<2x32xf32>
    %53 = arith.divf %51, %52 : vector<2x32xf32>
    %54 = vector.extract_strided_slice %47 {offsets = [0, 32], sizes = [2, 32], strides = [1, 1]} : vector<2x128xf32> to vector<2x32xf32>
    %55 = arith.negf %54 : vector<2x32xf32>
    %56 = math.exp %55 : vector<2x32xf32>
    %cst_19 = arith.constant 1.000000e+00 : f32
    %57 = vector.broadcast %cst_19 : f32 to vector<2x32xf32>
    %58 = arith.addf %57, %56 : vector<2x32xf32>
    %59 = arith.divf %57, %58 : vector<2x32xf32>
    %60 = vector.extract_strided_slice %47 {offsets = [0, 64], sizes = [2, 32], strides = [1, 1]} : vector<2x128xf32> to vector<2x32xf32>
    %61 = math.tanh %60 : vector<2x32xf32>
    %62 = vector.extract_strided_slice %47 {offsets = [0, 96], sizes = [2, 32], strides = [1, 1]} : vector<2x128xf32> to vector<2x32xf32>
    %63 = arith.negf %62 : vector<2x32xf32>
    %64 = math.exp %63 : vector<2x32xf32>
    %cst_20 = arith.constant 1.000000e+00 : f32
    %65 = vector.broadcast %cst_20 : f32 to vector<2x32xf32>
    %66 = arith.addf %65, %64 : vector<2x32xf32>
    %67 = arith.divf %65, %66 : vector<2x32xf32>
    %68 = arith.mulf %59, %41 : vector<2x32xf32>
    %69 = arith.mulf %53, %61 : vector<2x32xf32>
    %70 = arith.addf %68, %69 : vector<2x32xf32>
    %71 = math.tanh %70 : vector<2x32xf32>
    %72 = arith.mulf %67, %71 : vector<2x32xf32>
    %73 = vector.extract_strided_slice %11 {offsets = [0, 2, 0], sizes = [2, 1, 128], strides = [1, 1, 1]} : vector<2x8x128xf32> to vector<2x1x128xf32>
    %74 = vector.shape_cast %73 : vector<2x1x128xf32> to vector<2x128xf32>
    %cst_21 = arith.constant dense<0.000000e+00> : vector<2x128xf32>
    %75 = tpu.matmul %72, %12, %cst_21 {dimension_numbers = #tpu.dot_dimension_numbers<[1], [0], [0], [1], [0, 0, 1, 1], [], []>} : vector<2x32xf32>, vector<32x128xf32>, vector<2x128xf32> -> vector<2x128xf32>
    %76 = arith.addf %74, %75 : vector<2x128xf32>
    %77 = vector.extract_strided_slice %76 {offsets = [0, 0], sizes = [2, 32], strides = [1, 1]} : vector<2x128xf32> to vector<2x32xf32>
    %78 = arith.negf %77 : vector<2x32xf32>
    %79 = math.exp %78 : vector<2x32xf32>
    %cst_22 = arith.constant 1.000000e+00 : f32
    %80 = vector.broadcast %cst_22 : f32 to vector<2x32xf32>
    %81 = arith.addf %80, %79 : vector<2x32xf32>
    %82 = arith.divf %80, %81 : vector<2x32xf32>
    %83 = vector.extract_strided_slice %76 {offsets = [0, 32], sizes = [2, 32], strides = [1, 1]} : vector<2x128xf32> to vector<2x32xf32>
    %84 = arith.negf %83 : vector<2x32xf32>
    %85 = math.exp %84 : vector<2x32xf32>
    %cst_23 = arith.constant 1.000000e+00 : f32
    %86 = vector.broadcast %cst_23 : f32 to vector<2x32xf32>
    %87 = arith.addf %86, %85 : vector<2x32xf32>
    %88 = arith.divf %86, %87 : vector<2x32xf32>
    %89 = vector.extract_strided_slice %76 {offsets = [0, 64], sizes = [2, 32], strides = [1, 1]} : vector<2x128xf32> to vector<2x32xf32>
    %90 = math.tanh %89 : vector<2x32xf32>
    %91 = vector.extract_strided_slice %76 {offsets = [0, 96], sizes = [2, 32], strides = [1, 1]} : vector<2x128xf32> to vector<2x32xf32>
    %92 = arith.negf %91 : vector<2x32xf32>
    %93 = math.exp %92 : vector<2x32xf32>
    %cst_24 = arith.constant 1.000000e+00 : f32
    %94 = vector.broadcast %cst_24 : f32 to vector<2x32xf32>
    %95 = arith.addf %94, %93 : vector<2x32xf32>
    %96 = arith.divf %94, %95 : vector<2x32xf32>
    %97 = arith.mulf %88, %70 : vector<2x32xf32>
    %98 = arith.mulf %82, %90 : vector<2x32xf32>
    %99 = arith.addf %97, %98 : vector<2x32xf32>
    %100 = math.tanh %99 : vector<2x32xf32>
    %101 = arith.mulf %96, %100 : vector<2x32xf32>
    %102 = vector.extract_strided_slice %11 {offsets = [0, 3, 0], sizes = [2, 1, 128], strides = [1, 1, 1]} : vector<2x8x128xf32> to vector<2x1x128xf32>
    %103 = vector.shape_cast %102 : vector<2x1x128xf32> to vector<2x128xf32>
    %cst_25 = arith.constant dense<0.000000e+00> : vector<2x128xf32>
    %104 = tpu.matmul %101, %12, %cst_25 {dimension_numbers = #tpu.dot_dimension_numbers<[1], [0], [0], [1], [0, 0, 1, 1], [], []>} : vector<2x32xf32>, vector<32x128xf32>, vector<2x128xf32> -> vector<2x128xf32>
    %105 = arith.addf %103, %104 : vector<2x128xf32>
    %106 = vector.extract_strided_slice %105 {offsets = [0, 0], sizes = [2, 32], strides = [1, 1]} : vector<2x128xf32> to vector<2x32xf32>
    %107 = arith.negf %106 : vector<2x32xf32>
    %108 = math.exp %107 : vector<2x32xf32>
    %cst_26 = arith.constant 1.000000e+00 : f32
    %109 = vector.broadcast %cst_26 : f32 to vector<2x32xf32>
    %110 = arith.addf %109, %108 : vector<2x32xf32>
    %111 = arith.divf %109, %110 : vector<2x32xf32>
    %112 = vector.extract_strided_slice %105 {offsets = [0, 32], sizes = [2, 32], strides = [1, 1]} : vector<2x128xf32> to vector<2x32xf32>
    %113 = arith.negf %112 : vector<2x32xf32>
    %114 = math.exp %113 : vector<2x32xf32>
    %cst_27 = arith.constant 1.000000e+00 : f32
    %115 = vector.broadcast %cst_27 : f32 to vector<2x32xf32>
    %116 = arith.addf %115, %114 : vector<2x32xf32>
    %117 = arith.divf %115, %116 : vector<2x32xf32>
    %118 = vector.extract_strided_slice %105 {offsets = [0, 64], sizes = [2, 32], strides = [1, 1]} : vector<2x128xf32> to vector<2x32xf32>
    %119 = math.tanh %118 : vector<2x32xf32>
    %120 = vector.extract_strided_slice %105 {offsets = [0, 96], sizes = [2, 32], strides = [1, 1]} : vector<2x128xf32> to vector<2x32xf32>
    %121 = arith.negf %120 : vector<2x32xf32>
    %122 = math.exp %121 : vector<2x32xf32>
    %cst_28 = arith.constant 1.000000e+00 : f32
    %123 = vector.broadcast %cst_28 : f32 to vector<2x32xf32>
    %124 = arith.addf %123, %122 : vector<2x32xf32>
    %125 = arith.divf %123, %124 : vector<2x32xf32>
    %126 = arith.mulf %117, %99 : vector<2x32xf32>
    %127 = arith.mulf %111, %119 : vector<2x32xf32>
    %128 = arith.addf %126, %127 : vector<2x32xf32>
    %129 = math.tanh %128 : vector<2x32xf32>
    %130 = arith.mulf %125, %129 : vector<2x32xf32>
    %131 = vector.extract_strided_slice %11 {offsets = [0, 4, 0], sizes = [2, 1, 128], strides = [1, 1, 1]} : vector<2x8x128xf32> to vector<2x1x128xf32>
    %132 = vector.shape_cast %131 : vector<2x1x128xf32> to vector<2x128xf32>
    %cst_29 = arith.constant dense<0.000000e+00> : vector<2x128xf32>
    %133 = tpu.matmul %130, %12, %cst_29 {dimension_numbers = #tpu.dot_dimension_numbers<[1], [0], [0], [1], [0, 0, 1, 1], [], []>} : vector<2x32xf32>, vector<32x128xf32>, vector<2x128xf32> -> vector<2x128xf32>
    %134 = arith.addf %132, %133 : vector<2x128xf32>
    %135 = vector.extract_strided_slice %134 {offsets = [0, 0], sizes = [2, 32], strides = [1, 1]} : vector<2x128xf32> to vector<2x32xf32>
    %136 = arith.negf %135 : vector<2x32xf32>
    %137 = math.exp %136 : vector<2x32xf32>
    %cst_30 = arith.constant 1.000000e+00 : f32
    %138 = vector.broadcast %cst_30 : f32 to vector<2x32xf32>
    %139 = arith.addf %138, %137 : vector<2x32xf32>
    %140 = arith.divf %138, %139 : vector<2x32xf32>
    %141 = vector.extract_strided_slice %134 {offsets = [0, 32], sizes = [2, 32], strides = [1, 1]} : vector<2x128xf32> to vector<2x32xf32>
    %142 = arith.negf %141 : vector<2x32xf32>
    %143 = math.exp %142 : vector<2x32xf32>
    %cst_31 = arith.constant 1.000000e+00 : f32
    %144 = vector.broadcast %cst_31 : f32 to vector<2x32xf32>
    %145 = arith.addf %144, %143 : vector<2x32xf32>
    %146 = arith.divf %144, %145 : vector<2x32xf32>
    %147 = vector.extract_strided_slice %134 {offsets = [0, 64], sizes = [2, 32], strides = [1, 1]} : vector<2x128xf32> to vector<2x32xf32>
    %148 = math.tanh %147 : vector<2x32xf32>
    %149 = vector.extract_strided_slice %134 {offsets = [0, 96], sizes = [2, 32], strides = [1, 1]} : vector<2x128xf32> to vector<2x32xf32>
    %150 = arith.negf %149 : vector<2x32xf32>
    %151 = math.exp %150 : vector<2x32xf32>
    %cst_32 = arith.constant 1.000000e+00 : f32
    %152 = vector.broadcast %cst_32 : f32 to vector<2x32xf32>
    %153 = arith.addf %152, %151 : vector<2x32xf32>
    %154 = arith.divf %152, %153 : vector<2x32xf32>
    %155 = arith.mulf %146, %128 : vector<2x32xf32>
    %156 = arith.mulf %140, %148 : vector<2x32xf32>
    %157 = arith.addf %155, %156 : vector<2x32xf32>
    %158 = math.tanh %157 : vector<2x32xf32>
    %159 = arith.mulf %154, %158 : vector<2x32xf32>
    %160 = vector.extract_strided_slice %11 {offsets = [0, 5, 0], sizes = [2, 1, 128], strides = [1, 1, 1]} : vector<2x8x128xf32> to vector<2x1x128xf32>
    %161 = vector.shape_cast %160 : vector<2x1x128xf32> to vector<2x128xf32>
    %cst_33 = arith.constant dense<0.000000e+00> : vector<2x128xf32>
    %162 = tpu.matmul %159, %12, %cst_33 {dimension_numbers = #tpu.dot_dimension_numbers<[1], [0], [0], [1], [0, 0, 1, 1], [], []>} : vector<2x32xf32>, vector<32x128xf32>, vector<2x128xf32> -> vector<2x128xf32>
    %163 = arith.addf %161, %162 : vector<2x128xf32>
    %164 = vector.extract_strided_slice %163 {offsets = [0, 0], sizes = [2, 32], strides = [1, 1]} : vector<2x128xf32> to vector<2x32xf32>
    %165 = arith.negf %164 : vector<2x32xf32>
    %166 = math.exp %165 : vector<2x32xf32>
    %cst_34 = arith.constant 1.000000e+00 : f32
    %167 = vector.broadcast %cst_34 : f32 to vector<2x32xf32>
    %168 = arith.addf %167, %166 : vector<2x32xf32>
    %169 = arith.divf %167, %168 : vector<2x32xf32>
    %170 = vector.extract_strided_slice %163 {offsets = [0, 32], sizes = [2, 32], strides = [1, 1]} : vector<2x128xf32> to vector<2x32xf32>
    %171 = arith.negf %170 : vector<2x32xf32>
    %172 = math.exp %171 : vector<2x32xf32>
    %cst_35 = arith.constant 1.000000e+00 : f32
    %173 = vector.broadcast %cst_35 : f32 to vector<2x32xf32>
    %174 = arith.addf %173, %172 : vector<2x32xf32>
    %175 = arith.divf %173, %174 : vector<2x32xf32>
    %176 = vector.extract_strided_slice %163 {offsets = [0, 64], sizes = [2, 32], strides = [1, 1]} : vector<2x128xf32> to vector<2x32xf32>
    %177 = math.tanh %176 : vector<2x32xf32>
    %178 = vector.extract_strided_slice %163 {offsets = [0, 96], sizes = [2, 32], strides = [1, 1]} : vector<2x128xf32> to vector<2x32xf32>
    %179 = arith.negf %178 : vector<2x32xf32>
    %180 = math.exp %179 : vector<2x32xf32>
    %cst_36 = arith.constant 1.000000e+00 : f32
    %181 = vector.broadcast %cst_36 : f32 to vector<2x32xf32>
    %182 = arith.addf %181, %180 : vector<2x32xf32>
    %183 = arith.divf %181, %182 : vector<2x32xf32>
    %184 = arith.mulf %175, %157 : vector<2x32xf32>
    %185 = arith.mulf %169, %177 : vector<2x32xf32>
    %186 = arith.addf %184, %185 : vector<2x32xf32>
    %187 = math.tanh %186 : vector<2x32xf32>
    %188 = arith.mulf %183, %187 : vector<2x32xf32>
    %189 = vector.extract_strided_slice %11 {offsets = [0, 6, 0], sizes = [2, 1, 128], strides = [1, 1, 1]} : vector<2x8x128xf32> to vector<2x1x128xf32>
    %190 = vector.shape_cast %189 : vector<2x1x128xf32> to vector<2x128xf32>
    %cst_37 = arith.constant dense<0.000000e+00> : vector<2x128xf32>
    %191 = tpu.matmul %188, %12, %cst_37 {dimension_numbers = #tpu.dot_dimension_numbers<[1], [0], [0], [1], [0, 0, 1, 1], [], []>} : vector<2x32xf32>, vector<32x128xf32>, vector<2x128xf32> -> vector<2x128xf32>
    %192 = arith.addf %190, %191 : vector<2x128xf32>
    %193 = vector.extract_strided_slice %192 {offsets = [0, 0], sizes = [2, 32], strides = [1, 1]} : vector<2x128xf32> to vector<2x32xf32>
    %194 = arith.negf %193 : vector<2x32xf32>
    %195 = math.exp %194 : vector<2x32xf32>
    %cst_38 = arith.constant 1.000000e+00 : f32
    %196 = vector.broadcast %cst_38 : f32 to vector<2x32xf32>
    %197 = arith.addf %196, %195 : vector<2x32xf32>
    %198 = arith.divf %196, %197 : vector<2x32xf32>
    %199 = vector.extract_strided_slice %192 {offsets = [0, 32], sizes = [2, 32], strides = [1, 1]} : vector<2x128xf32> to vector<2x32xf32>
    %200 = arith.negf %199 : vector<2x32xf32>
    %201 = math.exp %200 : vector<2x32xf32>
    %cst_39 = arith.constant 1.000000e+00 : f32
    %202 = vector.broadcast %cst_39 : f32 to vector<2x32xf32>
    %203 = arith.addf %202, %201 : vector<2x32xf32>
    %204 = arith.divf %202, %203 : vector<2x32xf32>
    %205 = vector.extract_strided_slice %192 {offsets = [0, 64], sizes = [2, 32], strides = [1, 1]} : vector<2x128xf32> to vector<2x32xf32>
    %206 = math.tanh %205 : vector<2x32xf32>
    %207 = vector.extract_strided_slice %192 {offsets = [0, 96], sizes = [2, 32], strides = [1, 1]} : vector<2x128xf32> to vector<2x32xf32>
    %208 = arith.negf %207 : vector<2x32xf32>
    %209 = math.exp %208 : vector<2x32xf32>
    %cst_40 = arith.constant 1.000000e+00 : f32
    %210 = vector.broadcast %cst_40 : f32 to vector<2x32xf32>
    %211 = arith.addf %210, %209 : vector<2x32xf32>
    %212 = arith.divf %210, %211 : vector<2x32xf32>
    %213 = arith.mulf %204, %186 : vector<2x32xf32>
    %214 = arith.mulf %198, %206 : vector<2x32xf32>
    %215 = arith.addf %213, %214 : vector<2x32xf32>
    %216 = math.tanh %215 : vector<2x32xf32>
    %217 = arith.mulf %212, %216 : vector<2x32xf32>
    %218 = vector.extract_strided_slice %11 {offsets = [0, 7, 0], sizes = [2, 1, 128], strides = [1, 1, 1]} : vector<2x8x128xf32> to vector<2x1x128xf32>
    %219 = vector.shape_cast %218 : vector<2x1x128xf32> to vector<2x128xf32>
    %cst_41 = arith.constant dense<0.000000e+00> : vector<2x128xf32>
    %220 = tpu.matmul %217, %12, %cst_41 {dimension_numbers = #tpu.dot_dimension_numbers<[1], [0], [0], [1], [0, 0, 1, 1], [], []>} : vector<2x32xf32>, vector<32x128xf32>, vector<2x128xf32> -> vector<2x128xf32>
    %221 = arith.addf %219, %220 : vector<2x128xf32>
    %222 = vector.extract_strided_slice %221 {offsets = [0, 0], sizes = [2, 32], strides = [1, 1]} : vector<2x128xf32> to vector<2x32xf32>
    %223 = arith.negf %222 : vector<2x32xf32>
    %224 = math.exp %223 : vector<2x32xf32>
    %cst_42 = arith.constant 1.000000e+00 : f32
    %225 = vector.broadcast %cst_42 : f32 to vector<2x32xf32>
    %226 = arith.addf %225, %224 : vector<2x32xf32>
    %227 = arith.divf %225, %226 : vector<2x32xf32>
    %228 = vector.extract_strided_slice %221 {offsets = [0, 32], sizes = [2, 32], strides = [1, 1]} : vector<2x128xf32> to vector<2x32xf32>
    %229 = arith.negf %228 : vector<2x32xf32>
    %230 = math.exp %229 : vector<2x32xf32>
    %cst_43 = arith.constant 1.000000e+00 : f32
    %231 = vector.broadcast %cst_43 : f32 to vector<2x32xf32>
    %232 = arith.addf %231, %230 : vector<2x32xf32>
    %233 = arith.divf %231, %232 : vector<2x32xf32>
    %234 = vector.extract_strided_slice %221 {offsets = [0, 64], sizes = [2, 32], strides = [1, 1]} : vector<2x128xf32> to vector<2x32xf32>
    %235 = math.tanh %234 : vector<2x32xf32>
    %236 = vector.extract_strided_slice %221 {offsets = [0, 96], sizes = [2, 32], strides = [1, 1]} : vector<2x128xf32> to vector<2x32xf32>
    %237 = arith.negf %236 : vector<2x32xf32>
    %238 = math.exp %237 : vector<2x32xf32>
    %cst_44 = arith.constant 1.000000e+00 : f32
    %239 = vector.broadcast %cst_44 : f32 to vector<2x32xf32>
    %240 = arith.addf %239, %238 : vector<2x32xf32>
    %241 = arith.divf %239, %240 : vector<2x32xf32>
    %242 = arith.mulf %233, %215 : vector<2x32xf32>
    %243 = arith.mulf %227, %235 : vector<2x32xf32>
    %244 = arith.addf %242, %243 : vector<2x32xf32>
    %245 = math.tanh %244 : vector<2x32xf32>
    %246 = arith.mulf %241, %245 : vector<2x32xf32>
    %c0_45 = arith.constant 0 : index
    %c0_46 = arith.constant 0 : index
    %247 = vector.load %arg10[%c0_45, %c0_46] : memref<2x32xf32, #tpu.memory_space<vmem>>, vector<2x32xf32>
    tpu.vector_store %arg10[%c0_45, %c0_46], %246 {strides = array<i32>} : memref<2x32xf32, #tpu.memory_space<vmem>>, vector<2x32xf32>,
    %c0_47 = arith.constant 0 : index
    %c0_48 = arith.constant 0 : index
    %248 = vector.load %arg11[%c0_47, %c0_48] : memref<2x32xf32, #tpu.memory_space<vmem>>, vector<2x32xf32>
    tpu.vector_store %arg11[%c0_47, %c0_48], %244 {strides = array<i32>} : memref<2x32xf32, #tpu.memory_space<vmem>>, vector<2x32xf32>,
    %c0_i32_49 = arith.constant 0 : i32
    %249 = arith.cmpi eq, %arg0, %c0_i32_49 : i32
    %250 = arith.extui %249 : i1 to i32
    %c0_i32_50 = arith.constant 0 : i32
    %251 = arith.cmpi ne, %250, %c0_i32_50 : i32
    scf.if %251 {
      %c0_51 = arith.constant 0 : index
      %c0_52 = arith.constant 0 : index
      %252 = vector.load %arg7[%c0_51, %c0_52] : memref<1x32xf32, #tpu.memory_space<vmem>>, vector<1x32xf32>
      %253 = vector.broadcast %252 : vector<1x32xf32> to vector<2x32xf32>
      %254 = arith.mulf %246, %253 : vector<2x32xf32>
      %cst_53 = arith.constant dense<0.000000e+00> : vector<2xf32>
      %255 = vector.multi_reduction <add>, %254, %cst_53 [1] : vector<2x32xf32> to vector<2xf32>
      %256 = vector.shape_cast %255 : vector<2xf32> to vector<2x1xf32>
      %c0_54 = arith.constant 0 : index
      %c0_55 = arith.constant 0 : index
      %257 = vector.load %arg8[%c0_54, %c0_55] : memref<1x1xf32, #tpu.memory_space<vmem>>, vector<1x1xf32>
      %258 = vector.broadcast %257 : vector<1x1xf32> to vector<2x1xf32>
      %259 = arith.addf %256, %258 : vector<2x1xf32>
      %260 = math.tanh %259 : vector<2x1xf32>
      %c0_56 = arith.constant 0 : index
      %c0_57 = arith.constant 0 : index
      %261 = vector.load %arg9[%c0_56, %c0_57] : memref<2x1xf32, #tpu.memory_space<vmem>>, vector<2x1xf32>
      tpu.vector_store %arg9[%c0_56, %c0_57], %260 {strides = array<i32>} : memref<2x1xf32, #tpu.memory_space<vmem>>, vector<2x1xf32>,
    } else {
    }
    return
  }
  func.func @transform_0(%arg0: i32) -> (i32, i32, i32) {
    %c0_i32 = arith.constant 0 : i32
    %c0_i32_0 = arith.constant 0 : i32
    %c0_i32_1 = arith.constant 0 : i32
    return %c0_i32, %arg0, %c0_i32_0 : i32, i32, i32
  }
  func.func @transform_1(%arg0: i32) -> (i32, i32) {
    %c0_i32 = arith.constant 0 : i32
    %c0_i32_0 = arith.constant 0 : i32
    %c0_i32_1 = arith.constant 0 : i32
    return %c0_i32, %c0_i32_0 : i32, i32
  }
  func.func @transform_2(%arg0: i32) -> (i32, i32) {
    %c0_i32 = arith.constant 0 : i32
    %c0_i32_0 = arith.constant 0 : i32
    %c0_i32_1 = arith.constant 0 : i32
    return %c0_i32, %c0_i32_0 : i32, i32
  }
  func.func @transform_3(%arg0: i32) -> (i32, i32) {
    %c0_i32 = arith.constant 0 : i32
    %c0_i32_0 = arith.constant 0 : i32
    %c0_i32_1 = arith.constant 0 : i32
    return %c0_i32, %c0_i32_0 : i32, i32
  }
  func.func @transform_4(%arg0: i32) -> (i32, i32) {
    %c0_i32 = arith.constant 0 : i32
    %c0_i32_0 = arith.constant 0 : i32
    %c0_i32_1 = arith.constant 0 : i32
    return %c0_i32, %c0_i32_0 : i32, i32
  }
  func.func @transform_5(%arg0: i32) -> (i32, i32) {
    %c0_i32 = arith.constant 0 : i32
    %c0_i32_0 = arith.constant 0 : i32
    %c0_i32_1 = arith.constant 0 : i32
    return %c0_i32, %c0_i32_0 : i32, i32
  }
  func.func @transform_6(%arg0: i32) -> (i32, i32) {
    %c0_i32 = arith.constant 0 : i32
    %c0_i32_0 = arith.constant 0 : i32
    %c0_i32_1 = arith.constant 0 : i32
    return %c0_i32, %c0_i32_0 : i32, i32
  }
  func.func @transform_7(%arg0: i32) -> (i32, i32) {
    %c0_i32 = arith.constant 0 : i32
    %c0_i32_0 = arith.constant 0 : i32
    %c0_i32_1 = arith.constant 0 : i32
    return %c0_i32, %c0_i32_0 : i32, i32
  }
  func.func @transform_8(%arg0: i32) -> (i32, i32) {
    %c0_i32 = arith.constant 0 : i32
    %c0_i32_0 = arith.constant 0 : i32
    %c0_i32_1 = arith.constant 0 : i32
    return %c0_i32, %c0_i32_0 : i32, i32
  }
}

</mosaic_0001>

<bundles_post_ra>
// kernel: tpu_custom_call.1
= control target key start
LH: loop header
LB: loop body
LE: loop exit
PB: predicated region body
PF: predicated region fallthrough
CT: control target
= control target key end

     0   :  { %s1653_s0 = inlined_call_operand.hbm [shape: f32[2,8,16], index: 0, kind: input, shape index: {}]   ;;  %s1654_s1 = inlined_call_operand.vmem [shape: f32[2,32], index: 1, kind: input, shape index: {}]   ;;  %s1655_s2 = inlined_call_operand.hbm [shape: f32[2,32], index: 2, kind: input, shape index: {}]   ;;  %s1656_s3 = inlined_call_operand.hbm [shape: f32[16,128], index: 3, kind: input, shape index: {}]   ;;  %s1657_s4 = inlined_call_operand.hbm [shape: f32[32,128], index: 4, kind: input, shape index: {}]   ;;  %s1658_s5 = inlined_call_operand.vmem [shape: f32[1,128], index: 5, kind: input, shape index: {}]   ;;  %s1659_s6 = inlined_call_operand.vmem [shape: f32[1,32], index: 6, kind: input, shape index: {}]   ;;  %s1660_s7 = inlined_call_operand.<no memory space> [shape: f32[1,1], index: 7, kind: input, shape index: {}]   ;;  %s1661_s8 = inlined_call_operand.vmem [shape: f32[2,1], index: 8, kind: output, shape index: {}]  }
   0x1   :  { %v13_v0 = vstv %s1660_s7 }
   0x2   :  { %14 = vst [vmem:[#allocation4] sm:$0x1] %v13_v0 }
   0x3   :  { %15 = vsyncpa [#allocation6], 0 }
   0x4   :  { %16 = vsyncpa [#allocation8], 0  ;;  %s38_s9 = sshll.u32 %s1655_s2, 4  ;;  %s39_s9 = int_to_ptr.hbm [resolvable:$true] %s38_s9 }
   0x5   :  { %17 = vsyncpa [#allocation11], 0  ;;  %s1410_s10 = smov [#allocation7]   ;;  %s22_s14 = sshll.u32 %s1653_s0, 4  ;;  %s23_s14 = int_to_ptr.hbm [resolvable:$true] %s22_s14 }
   0x6   :  { %s40_s11 = sshll.u32 %s1410_s10, 4  ;;  %s1411_s15 = smov [#allocation5]   ;;  %s41_s11 = int_to_ptr.vmem [resolvable:$true] %s40_s11 }
   0x7   :  { %43 = dma.hbm_to_vmem [thread:$0]  %s39_s9, 32, %s41_s11, [#allocation8]  }
   0x8   :  { %s24_s7 = sshll.u32 %s1411_s15, 4  ;;  %s1412_s16 = smov 128   ;;  %s25_s7 = int_to_ptr.vmem [resolvable:$true] %s24_s7 }
   0x9   :  { %s1413_s17 = smov 8   ;;  %s48_s2 = sshll.u32 %s1656_s3, 4  ;;  %s49_s2 = int_to_ptr.hbm [resolvable:$true] %s48_s2 }
   0xa   :  { %30 = dma.hbm_to_vmem [thread:$0]  %s23_s14, 256, %s25_s7, [#allocation6], %s1412_s16, %s1412_s16, %s1413_s17  }
   0xb   :  { %s1414_s20 = smov [#allocation9]   ;;  %s61_s0 = sshll.u32 %s1657_s4, 4  ;;  %s62_s0 = int_to_ptr.hbm [resolvable:$true] %s61_s0 }
   0xc   :  { %s50_s21 = sshll.u32 %s1414_s20, 4  ;;  %s1415_s24 = smov [#allocation10]   ;;  %s51_s21 = int_to_ptr.vmem [resolvable:$true] %s50_s21 }
   0xd   :  { %56 = dma.hbm_to_vmem [thread:$0]  %s49_s2, 256, %s51_s21, [#allocation8], %s1412_s16, %s1412_s16, %s1413_s17  }
   0xe   :  { %s63_s25 = sshll.u32 %s1415_s24, 4  ;;  %s64_s25 = int_to_ptr.vmem [resolvable:$true] %s63_s25 }
   0xf   :  { %69 = dma.hbm_to_vmem [thread:$0]  %s62_s0, 512, %s64_s25, [#allocation11], %s1412_s16, %s1412_s16, %s1413_s17  }
  0x10   :  { %1404 = dma.done.wait [#allocation6], 256  }
  0x11   :  { %1405 = vsyncadd [#allocation6], 4294967040 }
  0x12   :  { %1406 = dma.done.wait [#allocation8], 288  }
  0x13   :  { %1407 = vsyncadd [#allocation8], 4294967008 }
  0x14   :  { %1408 = dma.done.wait [#allocation11], 512  }
  0x15   :  { %1409 = vsyncadd [#allocation11], 4294966784  ;;  %v104_v1 = vld [vmem:[#allocation9 + $0x8] sm:$0xff]  ;;  %v103_v3 = vld [vmem:[#allocation9] sm:$0xff]  ;;  %vm97_vm0 = vcmask 254976   ;;  %vm105_vm1 = vcmask 130048  }
  0x16   :  { %v144_v2 = vld [vmem:[#allocation10 + $0x18] sm:$0xff]  ;;  %126 = vmatpush.msra.mxu0 %v104_v1  ;;  %v143_v5 = vld [vmem:[#allocation10 + $0x10] sm:$0xff]  ;;  %v142_v6 = vld [vmem:[#allocation10 + $0x8] sm:$0xff]  ;;  %vm147_vm2 = vcmask 261120   ;;  %s1417_s28 = smov 64   ;;  %vm262_vm11 = vcmask 1041409  }
  0x17   :  { %163 = vmatpush.msra.mxu1 %v144_v2  ;;  %v101_v4 = vld [vmem:[#allocation5] sm:$0xff]  ;;  %v96_v8 = vld [vmem:[%s1654_s1] sm:$0x3]  ;;  %280 = vmatpush.msra.mxu2 %v144_v2  ;;  %v99_v9 = vld [vmem:[#allocation7] sm:$0x3]  ;;  %s1416_s1 = smov 32  }
  0x18   :  { %v141_v7 = vld [vmem:[#allocation10] sm:$0xff]  ;;  %394 = vmatpush.msra.mxu3 %v144_v2  ;;  %127 = vmatpush.msra.mxu0 %v103_v3  ;;  %98 = vst.msk [vmem:[#allocation2] sm:$0x3] %vm97_vm0, %v96_v8  ;;  %v1173_v15 = vld [vmem:[%s1658_s5] ss:$0 sm:$0xff]  ;;  %s1418_s30 = smov 96  }
  0x19   :  { %164 = vmatpush.msra.mxu1 %v143_v5  ;;  %1138 = vmatmul.msk.f32.vlgmr.msra.gmra.mxu0 %vm105_vm1, %v101_v4  ;;  %100 = vst.msk [vmem:[#allocation3] sm:$0x3] %vm97_vm0, %v99_v9  ;;  %v102_v10 = vld [vmem:[#allocation5 + $0x8] sm:$0xff] }
  0x1a   :  { %281 = vmatpush.msra.mxu2 %v143_v5  ;;  %395 = vmatpush.msra.mxu3 %v143_v5 }
  0x1b   :  { %165 = vmatpush.msra.mxu1 %v142_v6  ;;  %858 = vmatpush.msrb.mxu0 %v144_v2 }
  0x1c   :  { %282 = vmatpush.msra.mxu2 %v142_v6  ;;  %396 = vmatpush.msra.mxu3 %v142_v6 }
  0x1d   :  { %166 = vmatpush.msra.mxu1 %v141_v7  ;;  %859 = vmatpush.msrb.mxu0 %v143_v5 }
  0x1e   :  { %283 = vmatpush.msra.mxu2 %v141_v7  ;;  %397 = vmatpush.msra.mxu3 %v141_v7 }
  0x1f   :  { %510 = vmatpush.msrb.mxu1 %v144_v2  ;;  %v145_v11 = vld [vmem:[#allocation2] sm:$0x3]  ;;  %860 = vmatpush.msrb.mxu0 %v142_v6 }
  0x20   :  { %626 = vmatpush.msrb.mxu2 %v144_v2  ;;  %742 = vmatpush.msrb.mxu3 %v144_v2  ;;  %v146_v12 = vld [vmem:[#allocation3] sm:$0x3] }
  0x21   :  { %511 = vmatpush.msrb.mxu1 %v143_v5  ;;  %1139 = vmatmul.msk.f32.gmra.mxu0 %vm105_vm1, %v102_v10  ;;  %v218_v13 = vrot.slane %v146_v12, 1 }
  0x22   :  { %1140 = vmatmul.msk.f32.vlgmr.msra.gmra.mxu1 %vm147_vm2, %v145_v11  ;;  %627 = vmatpush.msrb.mxu2 %v143_v5 }
  0x23   :  { %512 = vmatpush.msrb.mxu1 %v142_v6  ;;  %743 = vmatpush.msrb.mxu3 %v143_v5 }
  0x24   :  { %628 = vmatpush.msrb.mxu2 %v142_v6  ;;  %221 = vrot.lane.b32.xlu1 %v218_v13, %s1416_s1 }
  0x25   :  { %513 = vmatpush.msrb.mxu1 %v141_v7  ;;  %744 = vmatpush.msrb.mxu3 %v142_v6 }
  0x26   :  { %629 = vmatpush.msrb.mxu2 %v141_v7  ;;  %861 = vmatpush.msrb.mxu0 %v141_v7 }
  0x27   :  { %974 = vmatpush.msra.mxu1 %v144_v2  ;;  %745 = vmatpush.msrb.mxu3 %v141_v7 }
  0x29   :  { %975 = vmatpush.msra.mxu1 %v143_v5 }
  0x2b   :  { %976 = vmatpush.msra.mxu1 %v142_v6 }
  0x2c   :  { %219 = vrot.lane.b32.xlu1 %v146_v12, %s1416_s1 }
  0x2d   :  { %977 = vmatpush.msra.mxu1 %v141_v7 }
  0x96   :  { %v129_v14 = vpop.f32.mrf.mxu0  ;;  %v222_v55 = vpop.permute.xlu1 %221 }
  0x97   :  { %v1495_v21 = vadd.f32 %v1173_v15, %v129_v14 }
  0x9e   :  { %v132_v18 = vpop.f32.mrf.mxu0  ;;  %v220_v59 = vpop.permute.xlu1 %219 }
  0x9f   :  { %v168_v16 = vpop.f32.mrf.mxu1  ;;  %v1492_v19 = vadd.f32 %v1173_v15, %v132_v18 }
  0xa0   :  { %v172_v17 = vrot.slane %v168_v16, 1  ;;  %v175_v22 = vadd.f32 %v168_v16, %v1495_v21 }
  0xa2   :  { %v176_v20 = vadd.f32 %v172_v17, %v1492_v19  ;;  %v1141_v26 = vmul.f32 -1.442695, %v175_v22 }
  0xa4   :  { %1176 = vtanh.f32 %v176_v20  ;;  %v1142_v25 = vmul.f32 -1.442695, %v176_v20 }
  0xa5   :  { %1178 = vtanh.f32 %v175_v22 }
  0xa6   :  { %1180 = vpow2.f32 %v1142_v25 }
  0xa7   :  { %1182 = vpow2.f32 %v1141_v26 }
  0xaa   :  { %v1177_v23 = vpop.eup %1176 }
  0xab   :  { %231 = vrot.lane.b32.xlu0 %v1177_v23, %s1417_s28  ;;  %v1179_v24 = vpop.eup %1178 }
  0xac   :  { %v1181_v27 = vpop.eup %1180 }
  0xad   :  { %v184_v28 = vadd.f32 1.0, %v1181_v27  ;;  %v1183_v29 = vpop.eup %1182 }
  0xae   :  { %v183_v30 = vadd.f32 1.0, %v1183_v29 }
  0xaf   :  { %1184 = vrcp.f32 %v184_v28  ;;  %v211_v39 = vand.u32 2147483648, %v184_v28  ;;  %vm205_vm4 = vweird.f32 %v184_v28  ;;  %v209_v40 = vand.u32 2147483647, %v184_v28 }
  0xb0   :  { %1186 = vrcp.f32 %v183_v30  ;;  %v196_v48 = vand.u32 2147483648, %v183_v30  ;;  %vm190_vm8 = vweird.f32 %v183_v30  ;;  %v194_v49 = vand.u32 2147483647, %v183_v30 }
  0xb1   :  { %v212_v43 = vor.u32 1.1754944e-38, %v211_v39  ;;  %vm210_vm6 = vcmp.eq.f32.partialorder %v209_v40, 8.507059e+37 }
  0xb2   :  { %v197_v51 = vor.u32 1.1754944e-38, %v196_v48  ;;  %vm195_vm10 = vcmp.eq.f32.partialorder %v194_v49, 8.507059e+37 }
  0xb3   :  { %229 = vrot.lane.b32.xlu0 %v1179_v24, %s1417_s28 }
  0xb5   :  { %v1185_v31 = vpop.eup %1184 }
  0xb6   :  { %v201_v32 = vmul.f32 %v1185_v31, %v184_v28  ;;  %v1187_v34 = vpop.eup %1186  ;;  %vm206_vm3 = vweird.f32 %v1185_v31 }
  0xb7   :  { %v186_v36 = vmul.f32 %v1187_v34, %v183_v30  ;;  %vm207_vm5 = vmor %vm205_vm4, %vm206_vm3  ;;  %vm191_vm7 = vweird.f32 %v1187_v34 }
  0xb8   :  { %v202_v33 = vsub.f32 1.0, %v201_v32  ;;  %vm192_vm9 = vmor %vm190_vm8, %vm191_vm7 }
  0xb9   :  { %v187_v38 = vsub.f32 1.0, %v186_v36 }
  0xba   :  { %v203_v35 = vmul.f32 %v1185_v31, %v202_v33 }
  0xbb   :  { %v188_v42 = vmul.f32 %v1187_v34, %v187_v38 }
  0xbc   :  { %v204_v37 = vadd.f32 %v1185_v31, %v203_v35 }
  0xbd   :  { %v189_v46 = vadd.f32 %v1187_v34, %v188_v42 }
  0xbe   :  { %v208_v41 = vsel %vm207_vm5, %v1185_v31, %v204_v37 }
  0xbf   :  { %v213_v44 = vsel %vm210_vm6, %v212_v43, %v208_v41  ;;  %v193_v50 = vsel %vm192_vm9, %v1187_v34, %v189_v46 }
  0xc0   :  { %v198_v52 = vsel %vm195_vm10, %v197_v51, %v193_v50  ;;  %v226_v56 = vmul.f32 %v222_v55, %v213_v44 }
  0xc1   :  { %v225_v60 = vmul.f32 %v220_v59, %v198_v52 }
 0x11d   :  { %v232_v45 = vpop.permute.xlu0 %231 }
 0x11e   :  { %v236_v47 = vmul.f32 %v232_v45, %v213_v44 }
 0x120   :  { %241 = vrot.lane.b32.xlu2 %v236_v47, %s1416_s1 }
 0x125   :  { %v230_v53 = vpop.permute.xlu0 %229 }
 0x126   :  { %v235_v54 = vmul.f32 %v230_v53, %v198_v52 }
 0x128   :  { %239 = vrot.lane.b32.xlu2 %v235_v54, %s1416_s1 }
 0x17a   :  { %v242_v57 = vpop.permute.xlu2 %241 }
 0x17b   :  { %v1502_v58 = vadd.f32 %v242_v57, %v226_v56 }
 0x17d   :  { %1188 = vtanh.f32 %v1502_v58  ;;  %v337_v51 = vrot.slane %v1502_v58, 7 }
 0x182   :  { %v240_v61 = vpop.permute.xlu2 %239 }
 0x183   :  { %v1189_v62 = vpop.eup %1188  ;;  %v1505_v63 = vadd.f32 %v240_v61, %v225_v60 }
 0x184   :  { %253 = vrot.lane.b32.xlu0 %v1189_v62, %s1417_s28 }
 0x185   :  { %1190 = vtanh.f32 %v1505_v63  ;;  %v336_v46 = vrot.slane %v1505_v63, 7 }
 0x18b   :  { %v1191_v0 = vpop.eup %1190 }
 0x18c   :  { %251 = vrot.lane.b32.xlu1 %v1191_v0, %s1417_s28 }
 0x1f6   :  { %v254_v1 = vpop.permute.xlu0 %253 }
 0x1f7   :  { %v258_v2 = vmul.f32 %v254_v1, %v213_v44 }
 0x1f9   :  { %v261_v4 = vrot.slane %v258_v2, 7 }
 0x1fe   :  { %v252_v3 = vpop.permute.xlu1 %251 }
 0x1ff   :  { %v257_v5 = vmul.f32 %v252_v3, %v198_v52 }
 0x201   :  { %v263_v6 = vsel %vm262_vm11, %v261_v4, %v257_v5 }
 0x202   :  { %264 = vrot.lane.b32.xlu2 %v263_v6, %s1416_s1 }
 0x25c   :  { %v265_v7 = vpop.permute.xlu2 %264 }
 0x25d   :  { %1143 = vmatmul.msk.f32.vlgmr.msra.gmra.mxu2 %vm147_vm2, %v265_v7 }
 0x2e0   :  { %v285_v8 = vpop.f32.mrf.mxu2 }
 0x2e1   :  { %v289_v9 = vrot.slane %v285_v8, 7  ;;  %v293_v10 = vadd.f32 %v285_v8, %v1492_v19 }
 0x2e3   :  { %v292_v11 = vadd.f32 %v289_v9, %v1495_v21  ;;  %1192 = vtanh.f32 %v293_v10  ;;  %v1145_v14 = vmul.f32 -1.442695, %v293_v10 }
 0x2e5   :  { %1194 = vtanh.f32 %v292_v11  ;;  %v1144_v15 = vmul.f32 -1.442695, %v292_v11 }
 0x2e6   :  { %1196 = vpow2.f32 %v1145_v14 }
 0x2e7   :  { %1198 = vpow2.f32 %v1144_v15 }
 0x2e9   :  { %v1193_v12 = vpop.eup %1192 }
 0x2ea   :  { %346 = vrot.lane.b32.xlu1 %v1193_v12, %s1417_s28 }
 0x2eb   :  { %v1195_v13 = vpop.eup %1194 }
 0x2ec   :  { %344 = vrot.lane.b32.xlu0 %v1195_v13, %s1417_s28  ;;  %v1197_v16 = vpop.eup %1196 }
 0x2ed   :  { %v1199_v17 = vpop.eup %1198  ;;  %v301_v18 = vadd.f32 1.0, %v1197_v16 }
 0x2ee   :  { %v300_v20 = vadd.f32 1.0, %v1199_v17 }
 0x2ef   :  { %1200 = vrcp.f32 %v301_v18  ;;  %v328_v31 = vand.u32 2147483648, %v301_v18  ;;  %vm322_vm13 = vweird.f32 %v301_v18  ;;  %v326_v32 = vand.u32 2147483647, %v301_v18 }
 0x2f0   :  { %1202 = vrcp.f32 %v300_v20  ;;  %v313_v35 = vand.u32 2147483648, %v300_v20  ;;  %vm307_vm0 = vweird.f32 %v300_v20  ;;  %v311_v37 = vand.u32 2147483647, %v300_v20 }
 0x2f1   :  { %v329_v36 = vor.u32 1.1754944e-38, %v328_v31  ;;  %vm327_vm1 = vcmp.eq.f32.partialorder %v326_v32, 8.507059e+37 }
 0x2f2   :  { %v314_v42 = vor.u32 1.1754944e-38, %v313_v35  ;;  %vm312_vm4 = vcmp.eq.f32.partialorder %v311_v37, 8.507059e+37 }
 0x2f5   :  { %v1201_v22 = vpop.eup %1200 }
 0x2f6   :  { %v1203_v23 = vpop.eup %1202  ;;  %v318_v24 = vmul.f32 %v1201_v22, %v301_v18  ;;  %vm323_vm12 = vweird.f32 %v1201_v22 }
 0x2f7   :  { %v303_v25 = vmul.f32 %v1203_v23, %v300_v20  ;;  %vm324_vm14 = vmor %vm322_vm13, %vm323_vm12  ;;  %vm308_vm15 = vweird.f32 %v1203_v23 }
 0x2f8   :  { %v319_v26 = vsub.f32 1.0, %v318_v24  ;;  %vm309_vm3 = vmor %vm307_vm0, %vm308_vm15 }
 0x2f9   :  { %v304_v27 = vsub.f32 1.0, %v303_v25 }
 0x2fa   :  { %v320_v28 = vmul.f32 %v1201_v22, %v319_v26 }
 0x2fb   :  { %v305_v29 = vmul.f32 %v1203_v23, %v304_v27 }
 0x2fc   :  { %v321_v30 = vadd.f32 %v1201_v22, %v320_v28 }
 0x2fd   :  { %v306_v33 = vadd.f32 %v1203_v23, %v305_v29 }
 0x2fe   :  { %v325_v34 = vsel %vm324_vm14, %v1201_v22, %v321_v30 }
 0x2ff   :  { %v330_v39 = vsel %vm327_vm1, %v329_v36, %v325_v34  ;;  %v310_v40 = vsel %vm309_vm3, %v1203_v23, %v306_v33 }
 0x300   :  { %v315_v44 = vsel %vm312_vm4, %v314_v42, %v310_v40  ;;  %v341_v52 = vmul.f32 %v337_v51, %v330_v39 }
 0x301   :  { %v340_v47 = vmul.f32 %v336_v46, %v315_v44 }
 0x35c   :  { %v347_v38 = vpop.permute.xlu1 %346 }
 0x35d   :  { %v351_v41 = vmul.f32 %v347_v38, %v330_v39 }
 0x35e   :  { %v345_v43 = vpop.permute.xlu0 %344 }
 0x35f   :  { %356 = vrot.lane.b32.xlu0 %v351_v41, %s1416_s1  ;;  %v350_v45 = vmul.f32 %v345_v43, %v315_v44 }
 0x361   :  { %354 = vrot.lane.b32.xlu2 %v350_v45, %s1416_s1 }
 0x3bb   :  { %v355_v48 = vpop.permute.xlu2 %354 }
 0x3bc   :  { %v1520_v49 = vadd.f32 %v355_v48, %v340_v47 }
 0x3be   :  { %1204 = vtanh.f32 %v1520_v49  ;;  %v451_v43 = vrot.slane %v1520_v49, 7 }
 0x3c4   :  { %v1205_v50 = vpop.eup %1204 }
 0x3c5   :  { %366 = vrot.lane.b32.xlu1 %v1205_v50, %s1417_s28 }
 0x3d1   :  { %v357_v53 = vpop.permute.xlu0 %356 }
 0x3d2   :  { %v1525_v54 = vadd.f32 %v357_v53, %v341_v52 }
 0x3d4   :  { %1206 = vtanh.f32 %v1525_v54  ;;  %v452_v38 = vrot.slane %v1525_v54, 7 }
 0x3da   :  { %v1207_v55 = vpop.eup %1206 }
 0x3db   :  { %368 = vrot.lane.b32.xlu2 %v1207_v55, %s1417_s28 }
 0x435   :  { %v369_v56 = vpop.permute.xlu2 %368 }
 0x436   :  { %v373_v60 = vmul.f32 %v369_v56, %v330_v39 }
 0x437   :  { %v367_v57 = vpop.permute.xlu1 %366 }
 0x438   :  { %v372_v59 = vmul.f32 %v367_v57, %v315_v44 }
 0x43a   :  { %v376_v61 = vrot.slane %v372_v59, 1 }
 0x43c   :  { %v377_v62 = vsel %vm262_vm11, %v373_v60, %v376_v61 }
 0x43d   :  { %378 = vrot.lane.b32.xlu0 %v377_v62, %s1416_s1 }
 0x4af   :  { %v379_v63 = vpop.permute.xlu0 %378 }
 0x4b0   :  { %1146 = vmatmul.msk.f32.vlgmr.msra.gmra.mxu3 %vm147_vm2, %v379_v63 }
 0x533   :  { %v399_v58 = vpop.f32.mrf.mxu3 }
 0x534   :  { %v403_v0 = vrot.slane %v399_v58, 6  ;;  %v404_v1 = vrot.slane %v399_v58, 7 }
 0x536   :  { %v407_v2 = vadd.f32 %v403_v0, %v1495_v21  ;;  %v408_v3 = vadd.f32 %v404_v1, %v1492_v19 }
 0x538   :  { %1208 = vtanh.f32 %v407_v2  ;;  %v1148_v6 = vmul.f32 -1.442695, %v408_v3  ;;  %v1147_v10 = vmul.f32 -1.442695, %v407_v2 }
 0x539   :  { %1210 = vtanh.f32 %v408_v3 }
 0x53a   :  { %1212 = vpow2.f32 %v1148_v6 }
 0x53e   :  { %v1209_v4 = vpop.eup %1208 }
 0x53f   :  { %v1211_v5 = vpop.eup %1210  ;;  %459 = vrot.lane.b32.xlu1 %v1209_v4, %s1417_s28 }
 0x540   :  { %461 = vrot.lane.b32.xlu2 %v1211_v5, %s1417_s28  ;;  %v1213_v7 = vpop.eup %1212 }
 0x541   :  { %v416_v8 = vadd.f32 1.0, %v1213_v7 }
 0x543   :  { %1214 = vrcp.f32 %v416_v8  ;;  %v443_v17 = vand.u32 2147483648, %v416_v8  ;;  %vm437_vm6 = vweird.f32 %v416_v8  ;;  %v441_v18 = vand.u32 2147483647, %v416_v8 }
 0x544   :  { %1216 = vpow2.f32 %v1147_v10 }
 0x545   :  { %v444_v22 = vor.u32 1.1754944e-38, %v443_v17  ;;  %vm442_vm8 = vcmp.eq.f32.partialorder %v441_v18, 8.507059e+37 }
 0x549   :  { %v1215_v9 = vpop.eup %1214 }
 0x54a   :  { %v433_v11 = vmul.f32 %v1215_v9, %v416_v8  ;;  %v1217_v13 = vpop.eup %1216  ;;  %vm438_vm5 = vweird.f32 %v1215_v9 }
 0x54b   :  { %v415_v15 = vadd.f32 1.0, %v1217_v13  ;;  %vm439_vm7 = vmor %vm437_vm6, %vm438_vm5 }
 0x54c   :  { %v434_v12 = vsub.f32 1.0, %v433_v11 }
 0x54d   :  { %1218 = vrcp.f32 %v415_v15  ;;  %v428_v31 = vand.u32 2147483648, %v415_v15  ;;  %vm422_vm10 = vweird.f32 %v415_v15  ;;  %v426_v32 = vand.u32 2147483647, %v415_v15 }
 0x54e   :  { %v435_v14 = vmul.f32 %v1215_v9, %v434_v12 }
 0x54f   :  { %v429_v34 = vor.u32 1.1754944e-38, %v428_v31  ;;  %vm427_vm13 = vcmp.eq.f32.partialorder %v426_v32, 8.507059e+37 }
 0x550   :  { %v436_v16 = vadd.f32 %v1215_v9, %v435_v14 }
 0x552   :  { %v440_v20 = vsel %vm439_vm7, %v1215_v9, %v436_v16 }
 0x553   :  { %v445_v24 = vsel %vm442_vm8, %v444_v22, %v440_v20  ;;  %v1219_v25 = vpop.eup %1218 }
 0x554   :  { %v418_v27 = vmul.f32 %v1219_v25, %v415_v15  ;;  %vm423_vm9 = vweird.f32 %v1219_v25  ;;  %v456_v39 = vmul.f32 %v452_v38, %v445_v24 }
 0x555   :  { %vm424_vm12 = vmor %vm422_vm10, %vm423_vm9 }
 0x556   :  { %v419_v28 = vsub.f32 1.0, %v418_v27 }
 0x558   :  { %v420_v29 = vmul.f32 %v1219_v25, %v419_v28 }
 0x55a   :  { %v421_v30 = vadd.f32 %v1219_v25, %v420_v29 }
 0x55c   :  { %v425_v33 = vsel %vm424_vm12, %v1219_v25, %v421_v30 }
 0x55d   :  { %v430_v36 = vsel %vm427_vm13, %v429_v34, %v425_v33 }
 0x55e   :  { %v455_v44 = vmul.f32 %v451_v43, %v430_v36 }
 0x59a   :  { %v462_v23 = vpop.permute.xlu2 %461 }
 0x59b   :  { %v466_v26 = vmul.f32 %v462_v23, %v445_v24 }
 0x59d   :  { %471 = vrot.lane.b32.xlu1 %v466_v26, %s1416_s1 }
 0x5b1   :  { %v460_v35 = vpop.permute.xlu1 %459 }
 0x5b2   :  { %v465_v37 = vmul.f32 %v460_v35, %v430_v36 }
 0x5b4   :  { %469 = vrot.lane.b32.xlu0 %v465_v37, %s1416_s1 }
 0x60f   :  { %v472_v40 = vpop.permute.xlu1 %471 }
 0x610   :  { %v1539_v41 = vadd.f32 %v472_v40, %v456_v39 }
 0x612   :  { %1220 = vtanh.f32 %v1539_v41  ;;  %v568_v32 = vrot.slane %v1539_v41, 7 }
 0x618   :  { %v1221_v42 = vpop.eup %1220 }
 0x619   :  { %483 = vrot.lane.b32.xlu0 %v1221_v42, %s1417_s28 }
 0x626   :  { %v470_v45 = vpop.permute.xlu0 %469 }
 0x627   :  { %v1544_v46 = vadd.f32 %v470_v45, %v455_v44 }
 0x629   :  { %1222 = vtanh.f32 %v1544_v46  ;;  %v567_v31 = vrot.slane %v1544_v46, 7 }
 0x62f   :  { %v1223_v47 = vpop.eup %1222 }
 0x630   :  { %481 = vrot.lane.b32.xlu2 %v1223_v47, %s1417_s28 }
 0x68a   :  { %v482_v48 = vpop.permute.xlu2 %481 }
 0x68b   :  { %v484_v50 = vpop.permute.xlu0 %483  ;;  %v487_v51 = vmul.f32 %v482_v48, %v430_v36 }
 0x68c   :  { %v488_v52 = vmul.f32 %v484_v50, %v445_v24 }
 0x68d   :  { %v491_v53 = vrot.slane %v487_v51, 2 }
 0x68e   :  { %v492_v54 = vrot.slane %v488_v52, 1 }
 0x690   :  { %v493_v55 = vsel %vm262_vm11, %v492_v54, %v491_v53 }
 0x691   :  { %494 = vrot.lane.b32.xlu1 %v493_v55, %s1416_s1 }
 0x703   :  { %v495_v49 = vpop.permute.xlu1 %494 }
 0x704   :  { %1149 = vmatmul.msk.f32.vlgmr.msrb.gmra.mxu1 %vm147_vm2, %v495_v49 }
 0x781   :  { %v515_v56 = vpop.f32.mrf.mxu1 }
 0x782   :  { %v519_v57 = vrot.slane %v515_v56, 5  ;;  %v520_v59 = vrot.slane %v515_v56, 6 }
 0x784   :  { %v523_v60 = vadd.f32 %v519_v57, %v1495_v21  ;;  %v524_v61 = vadd.f32 %v520_v59, %v1492_v19 }
 0x786   :  { %1224 = vtanh.f32 %v523_v60  ;;  %v1150_v58 = vmul.f32 -1.442695, %v523_v60  ;;  %v1151_v3 = vmul.f32 -1.442695, %v524_v61 }
 0x787   :  { %1226 = vtanh.f32 %v524_v61 }
 0x788   :  { %1228 = vpow2.f32 %v1150_v58 }
 0x78c   :  { %v1225_v62 = vpop.eup %1224 }
 0x78d   :  { %v1227_v63 = vpop.eup %1226  ;;  %575 = vrot.lane.b32.xlu2 %v1225_v62, %s1417_s28 }
 0x78e   :  { %577 = vrot.lane.b32.xlu0 %v1227_v63, %s1417_s28  ;;  %v1229_v0 = vpop.eup %1228 }
 0x78f   :  { %v531_v1 = vadd.f32 1.0, %v1229_v0 }
 0x791   :  { %1230 = vrcp.f32 %v531_v1  ;;  %v544_v10 = vand.u32 2147483648, %v531_v1  ;;  %vm538_vm15 = vweird.f32 %v531_v1  ;;  %v542_v11 = vand.u32 2147483647, %v531_v1 }
 0x792   :  { %1232 = vpow2.f32 %v1151_v3 }
 0x793   :  { %v545_v13 = vor.u32 1.1754944e-38, %v544_v10  ;;  %vm543_vm1 = vcmp.eq.f32.partialorder %v542_v11, 8.507059e+37 }
 0x797   :  { %v1231_v2 = vpop.eup %1230 }
 0x798   :  { %v534_v4 = vmul.f32 %v1231_v2, %v531_v1  ;;  %v1233_v7 = vpop.eup %1232  ;;  %vm539_vm14 = vweird.f32 %v1231_v2 }
 0x799   :  { %v532_v8 = vadd.f32 1.0, %v1233_v7  ;;  %vm540_vm0 = vmor %vm538_vm15, %vm539_vm14 }
 0x79a   :  { %v535_v5 = vsub.f32 1.0, %v534_v4 }
 0x79b   :  { %1234 = vrcp.f32 %v532_v8  ;;  %v559_v24 = vand.u32 2147483648, %v532_v8  ;;  %vm553_vm4 = vweird.f32 %v532_v8  ;;  %v557_v25 = vand.u32 2147483647, %v532_v8 }
 0x79c   :  { %v536_v6 = vmul.f32 %v1231_v2, %v535_v5 }
 0x79d   :  { %v560_v27 = vor.u32 1.1754944e-38, %v559_v24  ;;  %vm558_vm6 = vcmp.eq.f32.partialorder %v557_v25, 8.507059e+37 }
 0x79e   :  { %v537_v9 = vadd.f32 %v1231_v2, %v536_v6 }
 0x7a0   :  { %v541_v12 = vsel %vm540_vm0, %v1231_v2, %v537_v9 }
 0x7a1   :  { %v546_v15 = vsel %vm543_vm1, %v545_v13, %v541_v12  ;;  %v1235_v17 = vpop.eup %1234 }
 0x7a2   :  { %v549_v18 = vmul.f32 %v1235_v17, %v532_v8  ;;  %vm554_vm3 = vweird.f32 %v1235_v17  ;;  %v571_v33 = vmul.f32 %v567_v31, %v546_v15 }
 0x7a3   :  { %vm555_vm5 = vmor %vm553_vm4, %vm554_vm3 }
 0x7a4   :  { %v550_v20 = vsub.f32 1.0, %v549_v18 }
 0x7a6   :  { %v551_v22 = vmul.f32 %v1235_v17, %v550_v20 }
 0x7a8   :  { %v552_v23 = vadd.f32 %v1235_v17, %v551_v22 }
 0x7aa   :  { %v556_v26 = vsel %vm555_vm5, %v1235_v17, %v552_v23 }
 0x7ab   :  { %v561_v29 = vsel %vm558_vm6, %v560_v27, %v556_v26 }
 0x7ac   :  { %v572_v34 = vmul.f32 %v568_v32, %v561_v29 }
 0x7e7   :  { %v576_v14 = vpop.permute.xlu2 %575 }
 0x7e8   :  { %v581_v16 = vmul.f32 %v576_v14, %v546_v15 }
 0x7ea   :  { %585 = vrot.lane.b32.xlu1 %v581_v16, %s1416_s1 }
 0x800   :  { %v578_v28 = vpop.permute.xlu0 %577 }
 0x801   :  { %v582_v30 = vmul.f32 %v578_v28, %v561_v29 }
 0x803   :  { %587 = vrot.lane.b32.xlu2 %v582_v30, %s1416_s1 }
 0x85c   :  { %v586_v35 = vpop.permute.xlu1 %585 }
 0x85d   :  { %v588_v36 = vpop.permute.xlu2 %587  ;;  %v1559_v37 = vadd.f32 %v586_v35, %v571_v33 }
 0x85e   :  { %v1561_v38 = vadd.f32 %v588_v36, %v572_v34 }
 0x85f   :  { %1236 = vtanh.f32 %v1559_v37  ;;  %v683_v24 = vrot.slane %v1559_v37, 7 }
 0x860   :  { %1238 = vtanh.f32 %v1561_v38 }
 0x865   :  { %v1237_v39 = vpop.eup %1236 }
 0x866   :  { %v1239_v40 = vpop.eup %1238  ;;  %597 = vrot.lane.b32.xlu0 %v1237_v39, %s1417_s28 }
 0x867   :  { %599 = vrot.lane.b32.xlu1 %v1239_v40, %s1417_s28 }
 0x8d8   :  { %v598_v42 = vpop.permute.xlu0 %597 }
 0x8d9   :  { %v600_v41 = vpop.permute.xlu1 %599  ;;  %v603_v43 = vmul.f32 %v598_v42, %v546_v15 }
 0x8da   :  { %v604_v44 = vmul.f32 %v600_v41, %v561_v29  ;;  %v684_v29 = vrot.slane %v1561_v38, 7 }
 0x8db   :  { %v607_v45 = vrot.slane %v603_v43, 3 }
 0x8dc   :  { %v608_v46 = vrot.slane %v604_v44, 2 }
 0x8de   :  { %v609_v47 = vsel %vm262_vm11, %v608_v46, %v607_v45 }
 0x8df   :  { %610 = vrot.lane.b32.xlu2 %v609_v47, %s1416_s1 }
 0x939   :  { %v611_v48 = vpop.permute.xlu2 %610 }
 0x93a   :  { %1152 = vmatmul.msk.f32.vlgmr.msrb.gmra.mxu2 %vm147_vm2, %v611_v48 }
 0x9bd   :  { %v631_v50 = vpop.f32.mrf.mxu2 }
 0x9be   :  { %v635_v51 = vrot.slane %v631_v50, 4  ;;  %v636_v52 = vrot.slane %v631_v50, 5 }
 0x9c0   :  { %v639_v53 = vadd.f32 %v635_v51, %v1495_v21  ;;  %v640_v54 = vadd.f32 %v636_v52, %v1492_v19 }
 0x9c2   :  { %1240 = vtanh.f32 %v639_v53  ;;  %v1153_v56 = vmul.f32 -1.442695, %v639_v53  ;;  %v1154_v57 = vmul.f32 -1.442695, %v640_v54 }
 0x9c3   :  { %1242 = vtanh.f32 %v640_v54 }
 0x9c4   :  { %1244 = vpow2.f32 %v1153_v56 }
 0x9c5   :  { %1246 = vpow2.f32 %v1154_v57 }
 0x9c8   :  { %v1241_v55 = vpop.eup %1240 }
 0x9c9   :  { %v1243_v49 = vpop.eup %1242  ;;  %691 = vrot.lane.b32.xlu0 %v1241_v55, %s1417_s28 }
 0x9ca   :  { %693 = vrot.lane.b32.xlu1 %v1243_v49, %s1417_s28  ;;  %v1245_v59 = vpop.eup %1244 }
 0x9cb   :  { %v1247_v60 = vpop.eup %1246  ;;  %v647_v61 = vadd.f32 1.0, %v1245_v59 }
 0x9cc   :  { %v648_v62 = vadd.f32 1.0, %v1247_v60 }
 0x9cd   :  { %1248 = vrcp.f32 %v647_v61  ;;  %v660_v8 = vand.u32 2147483648, %v647_v61  ;;  %vm654_vm9 = vweird.f32 %v647_v61  ;;  %v658_v10 = vand.u32 2147483647, %v647_v61 }
 0x9ce   :  { %1250 = vrcp.f32 %v648_v62  ;;  %v675_v9 = vand.u32 2147483648, %v648_v62  ;;  %vm669_vm10 = vweird.f32 %v648_v62  ;;  %v673_v11 = vand.u32 2147483647, %v648_v62 }
 0x9cf   :  { %v661_v14 = vor.u32 1.1754944e-38, %v660_v8  ;;  %vm659_vm14 = vcmp.eq.f32.partialorder %v658_v10, 8.507059e+37 }
 0x9d0   :  { %v676_v15 = vor.u32 1.1754944e-38, %v675_v9  ;;  %vm674_vm15 = vcmp.eq.f32.partialorder %v673_v11, 8.507059e+37 }
 0x9d3   :  { %v1249_v63 = vpop.eup %1248 }
 0x9d4   :  { %v1251_v58 = vpop.eup %1250  ;;  %v650_v0 = vmul.f32 %v1249_v63, %v647_v61  ;;  %vm655_vm7 = vweird.f32 %v1249_v63 }
 0x9d5   :  { %v665_v1 = vmul.f32 %v1251_v58, %v648_v62  ;;  %vm670_vm8 = vweird.f32 %v1251_v58  ;;  %vm656_vm12 = vmor %vm654_vm9, %vm655_vm7 }
 0x9d6   :  { %v651_v2 = vsub.f32 1.0, %v650_v0  ;;  %vm671_vm13 = vmor %vm669_vm10, %vm670_vm8 }
 0x9d7   :  { %v666_v3 = vsub.f32 1.0, %v665_v1 }
 0x9d8   :  { %v652_v4 = vmul.f32 %v1249_v63, %v651_v2 }
 0x9d9   :  { %v667_v5 = vmul.f32 %v1251_v58, %v666_v3 }
 0x9da   :  { %v653_v6 = vadd.f32 %v1249_v63, %v652_v4 }
 0x9db   :  { %v668_v7 = vadd.f32 %v1251_v58, %v667_v5 }
 0x9dc   :  { %v657_v12 = vsel %vm656_vm12, %v1249_v63, %v653_v6 }
 0x9dd   :  { %v672_v13 = vsel %vm671_vm13, %v1251_v58, %v668_v7  ;;  %v662_v17 = vsel %vm659_vm14, %v661_v14, %v657_v12 }
 0x9de   :  { %v677_v20 = vsel %vm674_vm15, %v676_v15, %v672_v13  ;;  %v687_v25 = vmul.f32 %v683_v24, %v662_v17 }
 0x9df   :  { %v688_v30 = vmul.f32 %v684_v29, %v677_v20 }
 0xa3b   :  { %v692_v16 = vpop.permute.xlu0 %691 }
 0xa3c   :  { %v694_v18 = vpop.permute.xlu1 %693  ;;  %v697_v22 = vmul.f32 %v692_v16, %v662_v17 }
 0xa3d   :  { %v698_v23 = vmul.f32 %v694_v18, %v677_v20 }
 0xa3e   :  { %701 = vrot.lane.b32.xlu2 %v697_v22, %s1416_s1 }
 0xa3f   :  { %703 = vrot.lane.b32.xlu0 %v698_v23, %s1416_s1 }
 0xa98   :  { %v702_v26 = vpop.permute.xlu2 %701 }
 0xa99   :  { %v1577_v27 = vadd.f32 %v702_v26, %v687_v25 }
 0xa9b   :  { %1252 = vtanh.f32 %v1577_v27  ;;  %v799_v22 = vrot.slane %v1577_v27, 7 }
 0xaa1   :  { %v1253_v28 = vpop.eup %1252 }
 0xaa2   :  { %713 = vrot.lane.b32.xlu1 %v1253_v28, %s1417_s28 }
 0xab1   :  { %v704_v31 = vpop.permute.xlu0 %703 }
 0xab2   :  { %v1582_v32 = vadd.f32 %v704_v31, %v688_v30 }
 0xab4   :  { %1254 = vtanh.f32 %v1582_v32  ;;  %v800_v15 = vrot.slane %v1582_v32, 7 }
 0xaba   :  { %v1255_v33 = vpop.eup %1254 }
 0xabb   :  { %715 = vrot.lane.b32.xlu2 %v1255_v33, %s1417_s28 }
 0xb14   :  { %v714_v34 = vpop.permute.xlu1 %713 }
 0xb15   :  { %v716_v35 = vpop.permute.xlu2 %715  ;;  %v719_v36 = vmul.f32 %v714_v34, %v662_v17 }
 0xb16   :  { %v720_v37 = vmul.f32 %v716_v35, %v677_v20 }
 0xb17   :  { %v723_v39 = vrot.slane %v719_v36, 4 }
 0xb18   :  { %v724_v40 = vrot.slane %v720_v37, 3 }
 0xb1a   :  { %v725_v42 = vsel %vm262_vm11, %v724_v40, %v723_v39 }
 0xb1b   :  { %726 = vrot.lane.b32.xlu0 %v725_v42, %s1416_s1 }
 0xb8d   :  { %v727_v38 = vpop.permute.xlu0 %726 }
 0xb8e   :  { %1155 = vmatmul.msk.f32.vlgmr.msrb.gmra.mxu3 %vm147_vm2, %v727_v38 }
 0xc11   :  { %v747_v41 = vpop.f32.mrf.mxu3 }
 0xc12   :  { %v751_v43 = vrot.slane %v747_v41, 3  ;;  %v752_v44 = vrot.slane %v747_v41, 4 }
 0xc14   :  { %v755_v45 = vadd.f32 %v751_v43, %v1495_v21  ;;  %v756_v46 = vadd.f32 %v752_v44, %v1492_v19 }
 0xc16   :  { %1256 = vtanh.f32 %v755_v45  ;;  %v1157_v50 = vmul.f32 -1.442695, %v756_v46  ;;  %v1156_v54 = vmul.f32 -1.442695, %v755_v45 }
 0xc17   :  { %1258 = vtanh.f32 %v756_v46 }
 0xc18   :  { %1260 = vpow2.f32 %v1157_v50 }
 0xc1c   :  { %v1257_v47 = vpop.eup %1256 }
 0xc1d   :  { %v1259_v48 = vpop.eup %1258  ;;  %807 = vrot.lane.b32.xlu1 %v1257_v47, %s1417_s28 }
 0xc1e   :  { %809 = vrot.lane.b32.xlu2 %v1259_v48, %s1417_s28  ;;  %v1261_v51 = vpop.eup %1260 }
 0xc1f   :  { %v764_v52 = vadd.f32 1.0, %v1261_v51 }
 0xc21   :  { %1262 = vrcp.f32 %v764_v52  ;;  %v791_v61 = vand.u32 2147483648, %v764_v52  ;;  %vm785_vm1 = vweird.f32 %v764_v52  ;;  %v789_v62 = vand.u32 2147483647, %v764_v52 }
 0xc22   :  { %1264 = vpow2.f32 %v1156_v54 }
 0xc23   :  { %v792_v58 = vor.u32 1.1754944e-38, %v791_v61  ;;  %vm790_vm4 = vcmp.eq.f32.partialorder %v789_v62, 8.507059e+37 }
 0xc27   :  { %v1263_v53 = vpop.eup %1262 }
 0xc28   :  { %v781_v55 = vmul.f32 %v1263_v53, %v764_v52  ;;  %v1265_v56 = vpop.eup %1264  ;;  %vm786_vm0 = vweird.f32 %v1263_v53 }
 0xc29   :  { %v763_v59 = vadd.f32 1.0, %v1265_v56  ;;  %vm787_vm3 = vmor %vm785_vm1, %vm786_vm0 }
 0xc2a   :  { %v782_v49 = vsub.f32 1.0, %v781_v55 }
 0xc2b   :  { %1266 = vrcp.f32 %v763_v59  ;;  %v776_v8 = vand.u32 2147483648, %v763_v59  ;;  %vm770_vm6 = vweird.f32 %v763_v59  ;;  %v774_v9 = vand.u32 2147483647, %v763_v59 }
 0xc2c   :  { %v783_v57 = vmul.f32 %v1263_v53, %v782_v49 }
 0xc2d   :  { %v777_v11 = vor.u32 1.1754944e-38, %v776_v8  ;;  %vm775_vm8 = vcmp.eq.f32.partialorder %v774_v9, 8.507059e+37 }
 0xc2e   :  { %v784_v60 = vadd.f32 %v1263_v53, %v783_v57 }
 0xc30   :  { %v788_v63 = vsel %vm787_vm3, %v1263_v53, %v784_v60 }
 0xc31   :  { %v793_v1 = vsel %vm790_vm4, %v792_v58, %v788_v63  ;;  %v1267_v2 = vpop.eup %1266 }
 0xc32   :  { %v766_v4 = vmul.f32 %v1267_v2, %v763_v59  ;;  %vm771_vm5 = vweird.f32 %v1267_v2  ;;  %v804_v16 = vmul.f32 %v800_v15, %v793_v1 }
 0xc33   :  { %vm772_vm7 = vmor %vm770_vm6, %vm771_vm5 }
 0xc34   :  { %v767_v5 = vsub.f32 1.0, %v766_v4 }
 0xc36   :  { %v768_v6 = vmul.f32 %v1267_v2, %v767_v5 }
 0xc38   :  { %v769_v7 = vadd.f32 %v1267_v2, %v768_v6 }
 0xc3a   :  { %v773_v10 = vsel %vm772_vm7, %v1267_v2, %v769_v7 }
 0xc3b   :  { %v778_v13 = vsel %vm775_vm8, %v777_v11, %v773_v10 }
 0xc3c   :  { %v803_v23 = vmul.f32 %v799_v22, %v778_v13 }
 0xc78   :  { %v810_v0 = vpop.permute.xlu2 %809 }
 0xc79   :  { %v814_v3 = vmul.f32 %v810_v0, %v793_v1 }
 0xc7b   :  { %819 = vrot.lane.b32.xlu1 %v814_v3, %s1416_s1 }
 0xc8f   :  { %v808_v12 = vpop.permute.xlu1 %807 }
 0xc90   :  { %v813_v14 = vmul.f32 %v808_v12, %v778_v13 }
 0xc92   :  { %817 = vrot.lane.b32.xlu0 %v813_v14, %s1416_s1 }
 0xced   :  { %v820_v17 = vpop.permute.xlu1 %819 }
 0xcee   :  { %v1596_v18 = vadd.f32 %v820_v17, %v804_v16 }
 0xcf0   :  { %1268 = vtanh.f32 %v1596_v18  ;;  %v916_v9 = vrot.slane %v1596_v18, 7 }
 0xcf6   :  { %v1269_v20 = vpop.eup %1268 }
 0xcf7   :  { %831 = vrot.lane.b32.xlu0 %v1269_v20, %s1417_s28 }
 0xd04   :  { %v818_v24 = vpop.permute.xlu0 %817 }
 0xd05   :  { %v1601_v25 = vadd.f32 %v818_v24, %v803_v23 }
 0xd07   :  { %1270 = vtanh.f32 %v1601_v25  ;;  %v915_v8 = vrot.slane %v1601_v25, 7 }
 0xd0d   :  { %v1271_v26 = vpop.eup %1270 }
 0xd0e   :  { %829 = vrot.lane.b32.xlu2 %v1271_v26, %s1417_s28 }
 0xd68   :  { %v830_v28 = vpop.permute.xlu2 %829 }
 0xd69   :  { %v832_v29 = vpop.permute.xlu0 %831  ;;  %v835_v30 = vmul.f32 %v830_v28, %v778_v13 }
 0xd6a   :  { %v836_v31 = vmul.f32 %v832_v29, %v793_v1 }
 0xd6b   :  { %v839_v32 = vrot.slane %v835_v30, 5 }
 0xd6c   :  { %v840_v33 = vrot.slane %v836_v31, 4 }
 0xd6e   :  { %v841_v34 = vsel %vm262_vm11, %v840_v33, %v839_v32 }
 0xd6f   :  { %842 = vrot.lane.b32.xlu1 %v841_v34, %s1416_s1 }
 0xde1   :  { %v843_v27 = vpop.permute.xlu1 %842 }
 0xde2   :  { %1158 = vmatmul.msk.f32.vlgmr.msrb.gmra.mxu0 %vm147_vm2, %v843_v27 }
 0xe5f   :  { %v863_v35 = vpop.f32.mrf.mxu0 }
 0xe60   :  { %v867_v36 = vrot.slane %v863_v35, 2  ;;  %v868_v37 = vrot.slane %v863_v35, 3 }
 0xe62   :  { %v871_v39 = vadd.f32 %v867_v36, %v1495_v21  ;;  %v872_v40 = vadd.f32 %v868_v37, %v1492_v19 }
 0xe64   :  { %1272 = vtanh.f32 %v871_v39  ;;  %v1159_v41 = vmul.f32 -1.442695, %v871_v39  ;;  %v1160_v46 = vmul.f32 -1.442695, %v872_v40 }
 0xe65   :  { %1274 = vtanh.f32 %v872_v40 }
 0xe66   :  { %1276 = vpow2.f32 %v1159_v41 }
 0xe6a   :  { %v1273_v42 = vpop.eup %1272 }
 0xe6b   :  { %v1275_v38 = vpop.eup %1274  ;;  %923 = vrot.lane.b32.xlu2 %v1273_v42, %s1417_s28 }
 0xe6c   :  { %925 = vrot.lane.b32.xlu0 %v1275_v38, %s1417_s28  ;;  %v1277_v43 = vpop.eup %1276 }
 0xe6d   :  { %v879_v44 = vadd.f32 1.0, %v1277_v43 }
 0xe6f   :  { %1278 = vrcp.f32 %v879_v44  ;;  %v892_v54 = vand.u32 2147483648, %v879_v44  ;;  %vm886_vm10 = vweird.f32 %v879_v44  ;;  %v890_v55 = vand.u32 2147483647, %v879_v44 }
 0xe70   :  { %1280 = vpow2.f32 %v1160_v46 }
 0xe71   :  { %v893_v56 = vor.u32 1.1754944e-38, %v892_v54  ;;  %vm891_vm13 = vcmp.eq.f32.partialorder %v890_v55, 8.507059e+37 }
 0xe75   :  { %v1279_v45 = vpop.eup %1278 }
 0xe76   :  { %v882_v47 = vmul.f32 %v1279_v45, %v879_v44  ;;  %v1281_v51 = vpop.eup %1280  ;;  %vm887_vm9 = vweird.f32 %v1279_v45 }
 0xe77   :  { %v880_v52 = vadd.f32 1.0, %v1281_v51  ;;  %vm888_vm12 = vmor %vm886_vm10, %vm887_vm9  ;;  %vm1080_vm9 = vcmask 253952   ;;  %vm1078_vm10 = vcmask 261127  }
 0xe78   :  { %v883_v48 = vsub.f32 1.0, %v882_v47 }
 0xe79   :  { %1282 = vrcp.f32 %v880_v52  ;;  %v907_v1 = vand.u32 2147483648, %v880_v52  ;;  %vm901_vm15 = vweird.f32 %v880_v52  ;;  %v905_v2 = vand.u32 2147483647, %v880_v52 }
 0xe7a   :  { %v884_v50 = vmul.f32 %v1279_v45, %v883_v48 }
 0xe7b   :  { %v908_v4 = vor.u32 1.1754944e-38, %v907_v1  ;;  %vm906_vm1 = vcmp.eq.f32.partialorder %v905_v2, 8.507059e+37 }
 0xe7c   :  { %v885_v53 = vadd.f32 %v1279_v45, %v884_v50 }
 0xe7e   :  { %v889_v49 = vsel %vm888_vm12, %v1279_v45, %v885_v53  ;;  %vm1129_vm12 = vcmask 0  }
 0xe7f   :  { %v894_v59 = vsel %vm891_vm13, %v893_v56, %v889_v49  ;;  %v1283_v61 = vpop.eup %1282  ;;  %vm1127_vm13 = vcmask 7175  }
 0xe80   :  { %v897_v62 = vmul.f32 %v1283_v61, %v880_v52  ;;  %vm902_vm14 = vweird.f32 %v1283_v61  ;;  %v919_v10 = vmul.f32 %v915_v8, %v894_v59 }
 0xe81   :  { %vm903_vm0 = vmor %vm901_vm15, %vm902_vm14 }
 0xe82   :  { %v898_v63 = vsub.f32 1.0, %v897_v62 }
 0xe84   :  { %v899_v58 = vmul.f32 %v1283_v61, %v898_v63 }
 0xe86   :  { %v900_v0 = vadd.f32 %v1283_v61, %v899_v58  ;;  %v1174_v58 = vld [vmem:[%s1659_s6] ss:$0 sm:$0xff] }
 0xe88   :  { %v904_v3 = vsel %vm903_vm0, %v1283_v61, %v900_v0 }
 0xe89   :  { %v909_v6 = vsel %vm906_vm1, %v908_v4, %v904_v3 }
 0xe8a   :  { %v920_v11 = vmul.f32 %v916_v9, %v909_v6 }
 0xec5   :  { %v924_v57 = vpop.permute.xlu2 %923 }
 0xec6   :  { %v929_v60 = vmul.f32 %v924_v57, %v894_v59 }
 0xec8   :  { %933 = vrot.lane.b32.xlu1 %v929_v60, %s1416_s1 }
 0xede   :  { %v926_v5 = vpop.permute.xlu0 %925 }
 0xedf   :  { %v930_v7 = vmul.f32 %v926_v5, %v909_v6 }
 0xee1   :  { %935 = vrot.lane.b32.xlu2 %v930_v7, %s1416_s1 }
 0xf3a   :  { %v934_v12 = vpop.permute.xlu1 %933 }
 0xf3b   :  { %v936_v13 = vpop.permute.xlu2 %935  ;;  %v1616_v14 = vadd.f32 %v934_v12, %v919_v10 }
 0xf3c   :  { %v1618_v15 = vadd.f32 %v936_v13, %v920_v11 }
 0xf3d   :  { %1284 = vtanh.f32 %v1616_v14  ;;  %v1031_v5 = vrot.slane %v1616_v14, 7 }
 0xf3e   :  { %1286 = vtanh.f32 %v1618_v15  ;;  %v1032_v0 = vrot.slane %v1618_v15, 7 }
 0xf43   :  { %v1285_v16 = vpop.eup %1284 }
 0xf44   :  { %v1287_v17 = vpop.eup %1286  ;;  %945 = vrot.lane.b32.xlu0 %v1285_v16, %s1417_s28 }
 0xf45   :  { %947 = vrot.lane.b32.xlu1 %v1287_v17, %s1417_s28 }
 0xfb6   :  { %v946_v20 = vpop.permute.xlu0 %945 }
 0xfb7   :  { %v948_v18 = vpop.permute.xlu1 %947  ;;  %v951_v22 = vmul.f32 %v946_v20, %v894_v59 }
 0xfb8   :  { %v952_v23 = vmul.f32 %v948_v18, %v909_v6 }
 0xfb9   :  { %v955_v24 = vrot.slane %v951_v22, 6 }
 0xfba   :  { %v956_v25 = vrot.slane %v952_v23, 5 }
 0xfbc   :  { %v957_v26 = vsel %vm262_vm11, %v956_v25, %v955_v24 }
 0xfbd   :  { %958 = vrot.lane.b32.xlu2 %v957_v26, %s1416_s1 }
0x1017   :  { %v959_v28 = vpop.permute.xlu2 %958 }
0x1018   :  { %1161 = vmatmul.msk.f32.vlgmr.msra.gmra.mxu1 %vm147_vm2, %v959_v28 }
0x1095   :  { %v979_v29 = vpop.f32.mrf.mxu1 }
0x1096   :  { %v983_v30 = vrot.slane %v979_v29, 1  ;;  %v984_v31 = vrot.slane %v979_v29, 2 }
0x1098   :  { %v987_v32 = vadd.f32 %v983_v30, %v1495_v21  ;;  %v988_v33 = vadd.f32 %v984_v31, %v1492_v19  ;;  %v1175_v31 = vld [vmem:[#allocation4] ss:$0 sm:$0xff] }
0x109a   :  { %1288 = vtanh.f32 %v987_v32  ;;  %v1162_v35 = vmul.f32 -1.442695, %v987_v32  ;;  %v1163_v36 = vmul.f32 -1.442695, %v988_v33 }
0x109b   :  { %1290 = vtanh.f32 %v988_v33 }
0x109c   :  { %1292 = vpow2.f32 %v1162_v35 }
0x109d   :  { %1294 = vpow2.f32 %v1163_v36 }
0x10a0   :  { %v1289_v34 = vpop.eup %1288 }
0x10a1   :  { %v1291_v27 = vpop.eup %1290  ;;  %1039 = vrot.lane.b32.xlu1 %v1289_v34, %s1417_s28 }
0x10a2   :  { %1041 = vrot.lane.b32.xlu0 %v1291_v27, %s1417_s28  ;;  %v1293_v37 = vpop.eup %1292 }
0x10a3   :  { %v1295_v39 = vpop.eup %1294  ;;  %v995_v40 = vadd.f32 1.0, %v1293_v37 }
0x10a4   :  { %v996_v42 = vadd.f32 1.0, %v1295_v39 }
0x10a5   :  { %1296 = vrcp.f32 %v995_v40  ;;  %v1008_v50 = vand.u32 2147483648, %v995_v40  ;;  %vm1002_vm3 = vweird.f32 %v995_v40  ;;  %v1006_v52 = vand.u32 2147483647, %v995_v40 }
0x10a6   :  { %1298 = vrcp.f32 %v996_v42  ;;  %v1023_v51 = vand.u32 2147483648, %v996_v42  ;;  %vm1017_vm4 = vweird.f32 %v996_v42  ;;  %v1021_v53 = vand.u32 2147483647, %v996_v42 }
0x10a7   :  { %v1009_v49 = vor.u32 1.1754944e-38, %v1008_v50  ;;  %vm1007_vm7 = vcmp.eq.f32.partialorder %v1006_v52, 8.507059e+37 }
0x10a8   :  { %v1024_v56 = vor.u32 1.1754944e-38, %v1023_v51  ;;  %vm1022_vm8 = vcmp.eq.f32.partialorder %v1021_v53, 8.507059e+37 }
0x10ab   :  { %v1297_v21 = vpop.eup %1296 }
0x10ac   :  { %v1299_v19 = vpop.eup %1298  ;;  %v998_v38 = vmul.f32 %v1297_v21, %v995_v40  ;;  %vm1003_vm2 = vweird.f32 %v1297_v21 }
0x10ad   :  { %v1013_v41 = vmul.f32 %v1299_v19, %v996_v42  ;;  %vm1018_vm11 = vweird.f32 %v1299_v19  ;;  %vm1004_vm5 = vmor %vm1002_vm3, %vm1003_vm2 }
0x10ae   :  { %v999_v43 = vsub.f32 1.0, %v998_v38  ;;  %vm1019_vm6 = vmor %vm1017_vm4, %vm1018_vm11 }
0x10af   :  { %v1014_v44 = vsub.f32 1.0, %v1013_v41 }
0x10b0   :  { %v1000_v45 = vmul.f32 %v1297_v21, %v999_v43 }
0x10b1   :  { %v1015_v46 = vmul.f32 %v1299_v19, %v1014_v44 }
0x10b2   :  { %v1001_v47 = vadd.f32 %v1297_v21, %v1000_v45 }
0x10b3   :  { %v1016_v48 = vadd.f32 %v1299_v19, %v1015_v46 }
0x10b4   :  { %v1005_v54 = vsel %vm1004_vm5, %v1297_v21, %v1001_v47 }
0x10b5   :  { %v1020_v55 = vsel %vm1019_vm6, %v1299_v19, %v1016_v48  ;;  %v1010_v59 = vsel %vm1007_vm7, %v1009_v49, %v1005_v54 }
0x10b6   :  { %v1025_v61 = vsel %vm1022_vm8, %v1024_v56, %v1020_v55  ;;  %v1035_v6 = vmul.f32 %v1031_v5, %v1010_v59 }
0x10b7   :  { %v1036_v1 = vmul.f32 %v1032_v0, %v1025_v61 }
0x1113   :  { %v1040_v57 = vpop.permute.xlu1 %1039 }
0x1114   :  { %v1042_v60 = vpop.permute.xlu0 %1041  ;;  %v1045_v62 = vmul.f32 %v1040_v57, %v1010_v59 }
0x1115   :  { %v1046_v63 = vmul.f32 %v1042_v60, %v1025_v61 }
0x1116   :  { %1049 = vrot.lane.b32.xlu0 %v1045_v62, %s1416_s1 }
0x1117   :  { %1051 = vrot.lane.b32.xlu2 %v1046_v63, %s1416_s1 }
0x111e   :  { %1099 = vrot.lane.b32.xlu0 %v1174_v58, %s1418_s30 }
0x1171   :  { %v1052_v2 = vpop.permute.xlu2 %1051 }
0x1172   :  { %v1056_v3 = vadd.f32 %v1052_v2, %v1036_v1 }
0x1174   :  { %1300 = vtanh.f32 %v1056_v3  ;;  %v1084_v18 = vrot.slane %v1056_v3, 7 }
0x117a   :  { %v1301_v4 = vpop.eup %1300 }
0x117b   :  { %1063 = vrot.lane.b32.xlu1 %v1301_v4, %s1417_s28 }
0x1188   :  { %v1050_v7 = vpop.permute.xlu0 %1049 }
0x1189   :  { %v1055_v8 = vadd.f32 %v1050_v7, %v1035_v6 }
0x118b   :  { %1302 = vtanh.f32 %v1055_v8 }
0x1190   :  { %v1100_v11 = vpop.permute.xlu0 %1099 }
0x1191   :  { %v1303_v9 = vpop.eup %1302 }
0x1192   :  { %1061 = vrot.lane.b32.xlu2 %v1303_v9, %s1417_s28 }
0x11ec   :  { %v1062_v10 = vpop.permute.xlu2 %1061 }
0x11ed   :  { %v1064_v12 = vpop.permute.xlu1 %1063  ;;  %v1067_v13 = vmul.f32 %v1062_v10, %v1010_v59 }
0x11ee   :  { %v1068_v15 = vmul.f32 %v1064_v12, %v1025_v61 }
0x11ef   :  { %v1102_v16 = vmul.f32 %v1100_v11, %v1067_v13 }
0x11f0   :  { %v1103_v17 = vmul.f32 %v1100_v11, %v1068_v15  ;;  %v1071_v14 = vrot.slane %v1068_v15, 7 }
0x11f1   :  { %1107 = vrot.lane.b32.xlu1 %v1102_v16, %s1416_s1 }
0x11f2   :  { %v1106_v20 = vrot.slane %v1103_v17, 7 }
0x11f4   :  { %1109 = vrot.lane.b32.xlu2 %v1106_v20, %s1416_s1 }
0x11fc   :  { %1072 = vrot.lane.b32.xlu2 %v1067_v13, %s1416_s1 }
0x1204   :  { %1074 = vrot.lane.b32.xlu2 %v1071_v14, %s1416_s1 }
0x120c   :  { %1085 = vrot.lane.b32.xlu2 %v1055_v8, %s1418_s30 }
0x1214   :  { %1087 = vrot.lane.b32.xlu2 %v1084_v18, %s1418_s30 }
0x124e   :  { %v1110_v22 = vpop.permute.xlu2 %1109 }
0x124f   :  { %v1116_v23 = vsel %vm1080_vm9, %v1110_v22, 0.0 }
0x1250   :  { %1117 = vadd.xlane.f32.xlu1 %v1116_v23 }
0x1256   :  { %v1073_v24 = vpop.permute.xlu2 %1072 }
0x1257   :  { %1079 = vst.msk [vmem:[#allocation2 - $0x7] sm:$0x80] %vm1078_vm10, %v1073_v24 }
0x125e   :  { %v1075_v25 = vpop.permute.xlu2 %1074 }
0x125f   :  { %1081 = vst.msk [vmem:[#allocation2 + $0x1] sm:$0x1] %vm1080_vm9, %v1075_v25 }
0x1263   :  { %v1108_v26 = vpop.permute.xlu1 %1107 }
0x1264   :  { %v1113_v28 = vsel %vm1078_vm10, %v1108_v26, 0.0 }
0x1265   :  { %1114 = vadd.xlane.f32.xlu0 %v1113_v28 }
0x1266   :  { %v1086_v29 = vpop.permute.xlu2 %1085 }
0x1267   :  { %1091 = vst.msk [vmem:[#allocation3 - $0x7] sm:$0x80] %vm1078_vm10, %v1086_v29 }
0x126e   :  { %v1088_v30 = vpop.permute.xlu2 %1087 }
0x126f   :  { %1092 = vst.msk [vmem:[#allocation3 + $0x1] sm:$0x1] %vm1080_vm9, %v1088_v30 }
0x12c3   :  { %v1118_v32 = vpop.xlane.xlu1 %1117 }
0x12c4   :  { %v1124_v33 = vadd.f32 %v1175_v31, %v1118_v32 }
0x12c6   :  { %1304 = vtanh.f32 %v1124_v33 }
0x12cc   :  { %v1305_v34 = vpop.eup %1304 }
0x12cd   :  { %1130 = vst.msk [vmem:[%s1661_s8 + $0x1] sm:$0x1] %vm1129_vm12, %v1305_v34 }
0x12d8   :  { %v1115_v27 = vpop.xlane.xlu0 %1114 }
0x12d9   :  { %v1123_v35 = vadd.f32 %v1175_v31, %v1115_v27 }
0x12db   :  { %1306 = vtanh.f32 %v1123_v35 }
0x12e1   :  { %v1307_v36 = vpop.eup %1306 }
0x12e2   :  { %1128 = vst.msk [vmem:[%s1661_s8 - $0x7] sm:$0x80] %vm1127_vm13, %v1307_v36 }
0x12e3   :  { %1135 = vsyncpa [#allocation6], 1 }
0x12e4   :  { %1136 = vsyncpa [#allocation8], 1 }
0x12e5   :  { %1137 = vsyncpa [#allocation11], 1 }

</bundles_post_ra>
